<compile_context>
chip_gen: v6e
topology: v6e:2x2x1
jax: 0.10.0
libtpu: 0.0.40
codegen_flags: <defaults>
</compile_context>

<pallas_src>
import functools

import jax
import jax.numpy as jnp
from jax.experimental import pallas as pl
from jax.experimental.pallas import tpu as pltpu


# ----------------------------------------------------------------------------
# helpers
# ----------------------------------------------------------------------------

def _round_up(x, m):
    return (x + m - 1) // m * m


def _pick_tile(total, prefs):
    for p in prefs:
        if total % p == 0:
            return p
    return total


def _vmem_limit_bytes():
    # Per-generation scoped-VMEM limit: ~3/4 of physical VMEM (leaves headroom
    # for compiler scratch / semaphores).  ~48 MiB on v7x (64 MiB physical),
    # ~96 MiB on v5e/v6e (128 MiB physical).
    cap = 64 * 1024 * 1024
    try:
        info = pltpu.get_tpu_info()
        cap = int(getattr(info, "vmem_capacity_bytes", cap))
    except Exception:
        pass
    return min(cap * 3 // 4, 100 * 1024 * 1024)


_VMEM_LIMIT = _vmem_limit_bytes()


# ----------------------------------------------------------------------------
# Pallas kernels
# ----------------------------------------------------------------------------

def _matmul_bn_relu_kernel(p_ref, w_ref, s_ref, b_ref, o_ref, acc_ref):
    # p_ref: (tm, tk) bf16 patches, w_ref: (tk, tn) bf16, s/b: (1, tn) f32.
    k = pl.program_id(2)

    @pl.when(k == 0)
    def _init():
        acc_ref[...] = jnp.zeros_like(acc_ref)

    acc_ref[...] += jnp.dot(p_ref[...], w_ref[...],
                            preferred_element_type=jnp.float32)

    @pl.when(k == pl.num_programs(2) - 1)
    def _finalize():
        y = jnp.maximum(acc_ref[...] * s_ref[...] + b_ref[...], 0.0)
        o_ref[...] = y.astype(o_ref.dtype)


def _maxpool_3x3_s2_kernel(x00_ref, x01_ref, x10_ref, x11_ref, o_ref, *, oh, ow):
    # Phase views (even/odd rows x even/odd cols); every 3x3/s2 tap is a
    # contiguous slice of one phase -> pure elementwise VPU max, bf16 in/out.
    x00 = x00_ref[...]
    x01 = x01_ref[...]
    x10 = x10_ref[...]
    x11 = x11_ref[...]
    taps = (
        x00[:, 0:oh, 0:ow, :], x01[:, 0:oh, 0:ow, :], x00[:, 0:oh, 1:ow + 1, :],
        x10[:, 0:oh, 0:ow, :], x11[:, 0:oh, 0:ow, :], x10[:, 0:oh, 1:ow + 1, :],
        x00[:, 1:oh + 1, 0:ow, :], x01[:, 1:oh + 1, 0:ow, :],
        x00[:, 1:oh + 1, 1:ow + 1, :],
    )
    acc = taps[0]
    for t in taps[1:]:
        acc = jnp.maximum(acc, t)
    o_ref[...] = acc.astype(o_ref.dtype)


def _avgpool_3x3_s1_kernel(xp_ref, o_ref, *, h, w):
    # 3x3 stride-1 average (count_include_pad=True) over an already zero-padded
    # block: 9 shifted slices summed in f32, stored bf16.
    xp = xp_ref[...].astype(jnp.float32)
    acc = xp[:, 0:h, 0:w, :]
    for di in range(3):
        for dj in range(3):
            if di == 0 and dj == 0:
                continue
            acc = acc + xp[:, di:di + h, dj:dj + w, :]
    o_ref[...] = (acc * (1.0 / 9.0)).astype(o_ref.dtype)


def _head_kernel(f_ref, w_ref, b_ref, o_ref):
    # f_ref: (Np, HW, Cp) bf16 -> f32 spatial sum -> (Np, Cp) @ (Cp, Ep) + (1, Ep)
    # (the 1/(H*W) of the global average pool is folded into w outside).
    pooled = jnp.sum(f_ref[...].astype(jnp.float32), axis=1)
    o_ref[...] = jnp.dot(pooled, w_ref[...],
                         preferred_element_type=jnp.float32) + b_ref[...]


# ----------------------------------------------------------------------------
# gridded conv (im2col + matmul + fused BN/ReLU)
# ----------------------------------------------------------------------------

def _matmul_bn_relu(patches, w2d, scale, shift):
    """(M, K) @ (K, OC) with fused BN affine + ReLU, tiled & pipelined, bf16 out."""
    m, k = patches.shape
    oc = w2d.shape[1]

    kp = _round_up(k, 128)
    tk = kp if kp <= 2048 else _pick_tile(kp, (2048, 1024, 512, 256, 128))
    ocp = _round_up(oc, 128)
    tn = ocp if ocp <= 512 else _pick_tile(ocp, (512, 256, 128))
    tm = 512 if m >= 512 else _round_up(m, 16)     # 16: bf16 sublane packing
    mp = _round_up(m, tm)

    # cast to bf16 *before* padding so no f32 padded copy ever hits HBM
    p = jnp.pad(patches.astype(jnp.bfloat16), ((0, mp - m), (0, kp - k)))
    w = jnp.pad(w2d.astype(jnp.bfloat16), ((0, kp - k), (0, ocp - oc)))
    s = jnp.pad(scale.astype(jnp.float32), (0, ocp - oc)).reshape(1, ocp)
    b = jnp.pad(shift.astype(jnp.float32), (0, ocp - oc)).reshape(1, ocp)

    ksteps = kp // tk
    if ksteps > 1:
        # many short K steps only happen for very large K; triple-buffer the
        # streaming operands to keep the DMA hidden.
        ab_specs = [
            pl.BlockSpec((tm, tk), lambda i, j, kk: (i, kk),
                         pipeline_mode=pl.Buffered(3)),
            pl.BlockSpec((tk, tn), lambda i, j, kk: (kk, j),
                         pipeline_mode=pl.Buffered(3)),
        ]
    else:
        ab_specs = [
            pl.BlockSpec((tm, tk), lambda i, j, kk: (i, kk)),
            pl.BlockSpec((tk, tn), lambda i, j, kk: (kk, j)),
        ]

    grid = (mp // tm, ocp // tn, ksteps)
    out = pl.pallas_call(
        _matmul_bn_relu_kernel,
        out_shape=jax.ShapeDtypeStruct((mp, ocp), jnp.bfloat16),
        grid_spec=pltpu.PrefetchScalarGridSpec(
            num_scalar_prefetch=0,
            grid=grid,
            in_specs=ab_specs + [
                pl.BlockSpec((1, tn), lambda i, j, kk: (0, j)),
                pl.BlockSpec((1, tn), lambda i, j, kk: (0, j)),
            ],
            out_specs=pl.BlockSpec((tm, tn), lambda i, j, kk: (i, j)),
            scratch_shapes=[pltpu.VMEM((tm, tn), jnp.float32)],
        ),
        compiler_params=pltpu.CompilerParams(
            dimension_semantics=("parallel", "parallel", "arbitrary"),
            vmem_limit_bytes=_VMEM_LIMIT,
        ),
    )(p, w, s, b)
    return out[:m, :oc]


def _im2col_nhwc(x, kh, kw, stride, pad):
    # x: (N, H, W, C) bf16 -> patches (N*OH*OW, KH*KW*C); C stays fastest.
    if pad:
        x = jnp.pad(x, ((0, 0), (pad, pad), (pad, pad), (0, 0)))
    n, h, w, c = x.shape
    oh = (h - kh) // stride + 1
    ow = (w - kw) // stride + 1
    if kh == 1 and kw == 1 and stride == 1:
        return x.reshape(n * oh * ow, c), n, oh, ow      # 1x1: pure reshape
    taps = []
    for i in range(kh):
        for j in range(kw):
            taps.append(x[:, i:i + stride * oh:stride, j:j + stride * ow:stride, :])
    patches = jnp.stack(taps, axis=3)                    # (N, OH, OW, KH*KW, C)
    patches = patches.reshape(n * oh * ow, kh * kw * c)
    return patches, n, oh, ow


def _fold_bn(gamma, beta, mean, var, eps=1e-3):
    scale = gamma / jnp.sqrt(var + eps)
    shift = beta - mean * scale
    return scale, shift


def _conv_bn_relu(x, w, gamma, beta, mean, var, *, stride, pad):
    # torchvision BasicConv2d on an NHWC bf16 activation; weight is torch layout.
    oc, ic, kh, kw = w.shape
    scale, shift = _fold_bn(gamma, beta, mean, var)
    patches, n, oh, ow = _im2col_nhwc(x, kh, kw, stride, pad)
    w2d = jnp.transpose(w, (2, 3, 1, 0)).reshape(kh * kw * ic, oc)
    out = _matmul_bn_relu(patches, w2d, scale, shift)
    return out.reshape(n, oh, ow, oc)


def basic_conv2d(x, p, *, stride, pad):
    return _conv_bn_relu(x, p["w"], p["gamma"], p["beta"], p["mean"], p["var"],
                         stride=stride, pad=pad)


def basic_conv2d_fused(x, plist, *, stride, pad):
    """Several BasicConv2d with identical geometry sharing input x -> one matmul."""
    w = jnp.concatenate([p["w"] for p in plist], axis=0)
    gamma = jnp.concatenate([p["gamma"] for p in plist])
    beta = jnp.concatenate([p["beta"] for p in plist])
    mean = jnp.concatenate([p["mean"] for p in plist])
    var = jnp.concatenate([p["var"] for p in plist])
    out = _conv_bn_relu(x, w, gamma, beta, mean, var, stride=stride, pad=pad)
    outs, off = [], 0
    for p in plist:
        oc = p["w"].shape[0]
        outs.append(out[..., off:off + oc])
        off += oc
    return outs


# ----------------------------------------------------------------------------
# pooling kernels (NHWC, gridded over batch, bf16 in/out)
# ----------------------------------------------------------------------------

def max_pool_3x3_s2(x):
    n, h, w, c = x.shape
    oh = (h - 3) // 2 + 1
    ow = (w - 3) // 2 + 1
    phases = (
        x[:, 0::2, 0::2, :], x[:, 0::2, 1::2, :],
        x[:, 1::2, 0::2, :], x[:, 1::2, 1::2, :],
    )
    in_specs = [
        pl.BlockSpec((1,) + p.shape[1:], lambda i: (i, 0, 0, 0)) for p in phases
    ]
    return pl.pallas_call(
        functools.partial(_maxpool_3x3_s2_kernel, oh=oh, ow=ow),
        out_shape=jax.ShapeDtypeStruct((n, oh, ow, c), x.dtype),
        grid_spec=pltpu.PrefetchScalarGridSpec(
            num_scalar_prefetch=0,
            grid=(n,),
            in_specs=in_specs,
            out_specs=pl.BlockSpec((1, oh, ow, c), lambda i: (i, 0, 0, 0)),
        ),
        compiler_params=pltpu.CompilerParams(
            dimension_semantics=("parallel",),
            vmem_limit_bytes=_VMEM_LIMIT,
        ),
    )(*phases)


def avg_pool_3x3_s1_p1(x):
    # avg_pool2d(3, stride=1, pad=1, count_include_pad=True) as its own cheap
    # VPU kernel (no 9x weight/patch blowup in the following 1x1 conv).
    n, h, w, c = x.shape
    xp = jnp.pad(x, ((0, 0), (1, 1), (1, 1), (0, 0)))
    return pl.pallas_call(
        functools.partial(_avgpool_3x3_s1_kernel, h=h, w=w),
        out_shape=jax.ShapeDtypeStruct((n, h, w, c), x.dtype),
        grid_spec=pltpu.PrefetchScalarGridSpec(
            num_scalar_prefetch=0,
            grid=(n,),
            in_specs=[pl.BlockSpec((1, h + 2, w + 2, c), lambda i: (i, 0, 0, 0))],
            out_specs=pl.BlockSpec((1, h, w, c), lambda i: (i, 0, 0, 0)),
        ),
        compiler_params=pltpu.CompilerParams(
            dimension_semantics=("parallel",),
            vmem_limit_bytes=_VMEM_LIMIT,
        ),
    )(xp)


# ----------------------------------------------------------------------------
# fused global-average-pool + Linear head (lane/sublane padded)
# ----------------------------------------------------------------------------

def head(feats, fc_w, fc_b):
    n, h, w, c = feats.shape
    e = fc_w.shape[0]
    npad = _round_up(max(n, 8), 8)
    cpad = _round_up(c, 128)
    epad = _round_up(e, 128)

    f = feats.reshape(n, h * w, c).astype(jnp.bfloat16)
    f = jnp.pad(f, ((0, npad - n), (0, 0), (0, cpad - c)))
    # fold the 1/(H*W) of the global average pool into the fc weight
    wp = jnp.pad(fc_w.T * (1.0 / float(h * w)), ((0, cpad - c), (0, epad - e)))
    bp = jnp.pad(fc_b, (0, epad - e)).reshape(1, epad)

    out = pl.pallas_call(
        _head_kernel,
        out_shape=jax.ShapeDtypeStruct((npad, epad), jnp.float32),
        in_specs=[pl.BlockSpec(memory_space=pltpu.MemorySpace.VMEM)] * 3,
        out_specs=pl.BlockSpec(memory_space=pltpu.MemorySpace.VMEM),
        compiler_params=pltpu.CompilerParams(vmem_limit_bytes=_VMEM_LIMIT),
    )(f, wp, bp)
    return out[:n, :e]


# ----------------------------------------------------------------------------
# Model: mini inception_v3-style backbone + Linear(in_features, embedding_dim)
# ----------------------------------------------------------------------------

def _conv_params(key, oc, ic, kh, kw):
    k1, k2, k3, k4, k5 = jax.random.split(key, 5)
    return {
        "w": 0.1 * jax.random.normal(k1, (oc, ic, kh, kw), jnp.float32),
        "gamma": 1.0 + 0.1 * jax.random.normal(k2, (oc,), jnp.float32),
        "beta": 0.1 * jax.random.normal(k3, (oc,), jnp.float32),
        "mean": 0.1 * jax.random.normal(k4, (oc,), jnp.float32),
        "var": 1.0 + 0.1 * jax.random.uniform(k5, (oc,), jnp.float32),
    }


def init_params(key, embedding_dim=300):
    ks = jax.random.split(key, 12)
    in_features = 8 + 8 + 12 + 4  # channels after the InceptionA-style block
    return {
        "conv1": _conv_params(ks[0], 8, 3, 3, 3),     # stem 3x3 stride 2
        "conv2": _conv_params(ks[1], 16, 8, 3, 3),    # stem 3x3 stride 1 pad 1
        "b1x1": _conv_params(ks[2], 8, 16, 1, 1),
        "b5_1": _conv_params(ks[3], 6, 16, 1, 1),
        "b5_2": _conv_params(ks[4], 8, 6, 5, 5),
        "b3_1": _conv_params(ks[5], 8, 16, 1, 1),
        "b3_2": _conv_params(ks[6], 12, 8, 3, 3),
        "b3_3": _conv_params(ks[7], 12, 12, 3, 3),
        "bpool": _conv_params(ks[8], 4, 16, 1, 1),
        # Linear head -- exactly the module's init_weights(): N(0, 0.02), bias=0
        "fc_w": 0.02 * jax.random.normal(ks[9], (embedding_dim, in_features),
                                         jnp.float32),
        "fc_b": jnp.zeros((embedding_dim,), jnp.float32),
    }


def inception_forward(params, images):
    # transform_input=True (torchvision inception_v3(pretrained=True) default)
    x0 = images[:, 0:1] * (0.229 / 0.5) + (0.485 - 0.5) / 0.5
    x1 = images[:, 1:2] * (0.224 / 0.5) + (0.456 - 0.5) / 0.5
    x2 = images[:, 2:3] * (0.225 / 0.5) + (0.406 - 0.5) / 0.5
    x = jnp.concatenate([x0, x1, x2], axis=1).astype(jnp.bfloat16)
    x = jnp.transpose(x, (0, 2, 3, 1))        # NCHW -> NHWC once; bf16 after

    # Stem
    x = basic_conv2d(x, params["conv1"], stride=2, pad=0)
    x = basic_conv2d(x, params["conv2"], stride=1, pad=1)
    x = max_pool_3x3_s2(x)

    # InceptionA-style multi-branch block
    # the three 1x1 branch convs that share x are fused into one lane-dense matmul
    b1, b5, b3 = basic_conv2d_fused(
        x, [params["b1x1"], params["b5_1"], params["b3_1"]], stride=1, pad=0)
    b5 = basic_conv2d(b5, params["b5_2"], stride=1, pad=2)
    b3 = basic_conv2d(b3, params["b3_2"], stride=1, pad=1)
    b3 = basic_conv2d(b3, params["b3_3"], stride=1, pad=1)
    bp = basic_conv2d(avg_pool_3x3_s1_p1(x), params["bpool"], stride=1, pad=0)
    feats = jnp.concatenate([b1, b5, b3, bp], axis=-1)      # (N, H, W, C) bf16

    # Fused global-average-pool + Linear(in_features -> embedding_dim)
    return head(feats, params["fc_w"], params["fc_b"])


if __name__ == "__main__":
    key = jax.random.PRNGKey(0)
    k_params, k_img = jax.random.split(key)
    params = init_params(k_params, embedding_dim=300)
    images = jax.random.normal(k_img, (2, 3, 32, 32), jnp.float32)

    fwd = jax.jit(inception_forward)
    embed = fwd(params, images)
    jax.block_until_ready(embed)
    assert embed.shape == (2, 300) and embed.dtype == jnp.float32
    print("KERNEL_OK")
</pallas_src>

<mosaic_0001>
module attributes {stable_mosaic.version = 11 : i64} {
  func.func @_matmul_bn_relu_kernel(%arg0: i32, %arg1: i32, %arg2: i32, %arg3: memref<464x128xbf16, #tpu.memory_space<vmem>>, %arg4: memref<128x128xbf16, #tpu.memory_space<vmem>>, %arg5: memref<1x128xf32, #tpu.memory_space<vmem>>, %arg6: memref<1x128xf32, #tpu.memory_space<vmem>>, %arg7: memref<464x128xbf16, #tpu.memory_space<vmem>>, %arg8: memref<464x128xf32, #tpu.memory_space<vmem>>) attributes {dimension_semantics = [#tpu.dimension_semantics<parallel>, #tpu.dimension_semantics<parallel>, #tpu.dimension_semantics<arbitrary>], iteration_bounds = array<i64: 1, 1, 1>, scalar_prefetch = 0 : i64, scratch_operands = 1 : i64, tpu.core_type = #tpu.core_type<tc>, window_params = [{transform_indices = @transform_0, window_bounds = array<i64: 464, 128>}, {transform_indices = @transform_1, window_bounds = array<i64: 128, 128>}, {transform_indices = @transform_2, window_bounds = array<i64: 1, 128>}, {transform_indices = @transform_3, window_bounds = array<i64: 1, 128>}, {transform_indices = @transform_4, window_bounds = array<i64: 464, 128>}]} {
    %c0_i32 = arith.constant 0 : i32
    %0 = arith.cmpi eq, %arg2, %c0_i32 : i32
    %1 = arith.extui %0 : i1 to i32
    %c0_i32_0 = arith.constant 0 : i32
    %2 = arith.cmpi ne, %1, %c0_i32_0 : i32
    scf.if %2 {
      %cst_10 = arith.constant 0.000000e+00 : f32
      %12 = vector.broadcast %cst_10 : f32 to vector<464x128xf32>
      %c0_11 = arith.constant 0 : index
      %c0_12 = arith.constant 0 : index
      %13 = vector.load %arg8[%c0_11, %c0_12] : memref<464x128xf32, #tpu.memory_space<vmem>>, vector<464x128xf32>
      tpu.vector_store %arg8[%c0_11, %c0_12], %12 {strides = array<i32>} : memref<464x128xf32, #tpu.memory_space<vmem>>, vector<464x128xf32>,
    } else {
    }
    %c0 = arith.constant 0 : index
    %c0_1 = arith.constant 0 : index
    %3 = vector.load %arg8[%c0, %c0_1] : memref<464x128xf32, #tpu.memory_space<vmem>>, vector<464x128xf32>
    %c0_2 = arith.constant 0 : index
    %c0_3 = arith.constant 0 : index
    %4 = vector.load %arg3[%c0_2, %c0_3] : memref<464x128xbf16, #tpu.memory_space<vmem>>, vector<464x128xbf16>
    %c0_4 = arith.constant 0 : index
    %c0_5 = arith.constant 0 : index
    %5 = vector.load %arg4[%c0_4, %c0_5] : memref<128x128xbf16, #tpu.memory_space<vmem>>, vector<128x128xbf16>
    %cst = arith.constant dense<0.000000e+00> : vector<464x128xf32>
    %6 = tpu.matmul %4, %5, %cst {dimension_numbers = #tpu.dot_dimension_numbers<[1], [0], [0], [1], [0, 0, 1, 1], [], []>} : vector<464x128xbf16>, vector<128x128xbf16>, vector<464x128xf32> -> vector<464x128xf32>
    %7 = arith.addf %3, %6 : vector<464x128xf32>
    %c0_6 = arith.constant 0 : index
    %c0_7 = arith.constant 0 : index
    %8 = vector.load %arg8[%c0_6, %c0_7] : memref<464x128xf32, #tpu.memory_space<vmem>>, vector<464x128xf32>
    tpu.vector_store %arg8[%c0_6, %c0_7], %7 {strides = array<i32>} : memref<464x128xf32, #tpu.memory_space<vmem>>, vector<464x128xf32>,
    %c0_i32_8 = arith.constant 0 : i32
    %9 = arith.cmpi eq, %arg2, %c0_i32_8 : i32
    %10 = arith.extui %9 : i1 to i32
    %c0_i32_9 = arith.constant 0 : i32
    %11 = arith.cmpi ne, %10, %c0_i32_9 : i32
    scf.if %11 {
      %c0_10 = arith.constant 0 : index
      %c0_11 = arith.constant 0 : index
      %12 = vector.load %arg8[%c0_10, %c0_11] : memref<464x128xf32, #tpu.memory_space<vmem>>, vector<464x128xf32>
      %c0_12 = arith.constant 0 : index
      %c0_13 = arith.constant 0 : index
      %13 = vector.load %arg5[%c0_12, %c0_13] : memref<1x128xf32, #tpu.memory_space<vmem>>, vector<1x128xf32>
      %14 = vector.broadcast %13 : vector<1x128xf32> to vector<464x128xf32>
      %15 = arith.mulf %12, %14 : vector<464x128xf32>
      %c0_14 = arith.constant 0 : index
      %c0_15 = arith.constant 0 : index
      %16 = vector.load %arg6[%c0_14, %c0_15] : memref<1x128xf32, #tpu.memory_space<vmem>>, vector<1x128xf32>
      %17 = vector.broadcast %16 : vector<1x128xf32> to vector<464x128xf32>
      %18 = arith.addf %15, %17 : vector<464x128xf32>
      %cst_16 = arith.constant 0.000000e+00 : f32
      %19 = vector.broadcast %cst_16 : f32 to vector<464x128xf32>
      %20 = arith.maximumf %18, %19 : vector<464x128xf32>
      %21 = arith.truncf %20 : vector<464x128xf32> to vector<464x128xbf16>
      %c0_17 = arith.constant 0 : index
      %c0_18 = arith.constant 0 : index
      %22 = vector.load %arg7[%c0_17, %c0_18] : memref<464x128xbf16, #tpu.memory_space<vmem>>, vector<464x128xbf16>
      tpu.vector_store %arg7[%c0_17, %c0_18], %21 {strides = array<i32>} : memref<464x128xbf16, #tpu.memory_space<vmem>>, vector<464x128xbf16>,
    } else {
    }
    return
  }
  func.func @transform_0(%arg0: i32, %arg1: i32, %arg2: i32) -> (i32, i32) {
    %c0_i32 = arith.constant 0 : i32
    return %arg0, %arg2 : i32, i32
  }
  func.func @transform_1(%arg0: i32, %arg1: i32, %arg2: i32) -> (i32, i32) {
    %c0_i32 = arith.constant 0 : i32
    return %arg2, %arg1 : i32, i32
  }
  func.func @transform_2(%arg0: i32, %arg1: i32, %arg2: i32) -> (i32, i32) {
    %c0_i32 = arith.constant 0 : i32
    %c0_i32_0 = arith.constant 0 : i32
    return %c0_i32, %arg1 : i32, i32
  }
  func.func @transform_3(%arg0: i32, %arg1: i32, %arg2: i32) -> (i32, i32) {
    %c0_i32 = arith.constant 0 : i32
    %c0_i32_0 = arith.constant 0 : i32
    return %c0_i32, %arg1 : i32, i32
  }
  func.func @transform_4(%arg0: i32, %arg1: i32, %arg2: i32) -> (i32, i32) {
    %c0_i32 = arith.constant 0 : i32
    return %arg0, %arg1 : i32, i32
  }
}

module attributes {stable_mosaic.version = 11 : i64} {
  func.func @_maxpool_3x3_s2_kernel(%arg0: i32, %arg1: memref<1x8x8x16xbf16, #tpu.memory_space<vmem>>, %arg2: memref<1x8x7x16xbf16, #tpu.memory_space<vmem>>, %arg3: memref<1x7x8x16xbf16, #tpu.memory_space<vmem>>, %arg4: memref<1x7x7x16xbf16, #tpu.memory_space<vmem>>, %arg5: memref<1x7x7x16xbf16, #tpu.memory_space<vmem>>) attributes {dimension_semantics = [#tpu.dimension_semantics<parallel>], iteration_bounds = array<i64: 2>, scalar_prefetch = 0 : i64, scratch_operands = 0 : i64, tpu.core_type = #tpu.core_type<tc>, window_params = [{transform_indices = @transform_0, window_bounds = array<i64: 1, 8, 8, 16>}, {transform_indices = @transform_1, window_bounds = array<i64: 1, 8, 7, 16>}, {transform_indices = @transform_2, window_bounds = array<i64: 1, 7, 8, 16>}, {transform_indices = @transform_3, window_bounds = array<i64: 1, 7, 7, 16>}, {transform_indices = @transform_4, window_bounds = array<i64: 1, 7, 7, 16>}]} {
    %c0 = arith.constant 0 : index
    %c0_0 = arith.constant 0 : index
    %c0_1 = arith.constant 0 : index
    %c0_2 = arith.constant 0 : index
    %0 = vector.load %arg1[%c0, %c0_0, %c0_1, %c0_2] : memref<1x8x8x16xbf16, #tpu.memory_space<vmem>>, vector<1x8x8x16xbf16>
    %c0_3 = arith.constant 0 : index
    %c0_4 = arith.constant 0 : index
    %c0_5 = arith.constant 0 : index
    %c0_6 = arith.constant 0 : index
    %1 = vector.load %arg2[%c0_3, %c0_4, %c0_5, %c0_6] : memref<1x8x7x16xbf16, #tpu.memory_space<vmem>>, vector<1x8x7x16xbf16>
    %c0_7 = arith.constant 0 : index
    %c0_8 = arith.constant 0 : index
    %c0_9 = arith.constant 0 : index
    %c0_10 = arith.constant 0 : index
    %2 = vector.load %arg3[%c0_7, %c0_8, %c0_9, %c0_10] : memref<1x7x8x16xbf16, #tpu.memory_space<vmem>>, vector<1x7x8x16xbf16>
    %c0_11 = arith.constant 0 : index
    %c0_12 = arith.constant 0 : index
    %c0_13 = arith.constant 0 : index
    %c0_14 = arith.constant 0 : index
    %3 = vector.load %arg4[%c0_11, %c0_12, %c0_13, %c0_14] : memref<1x7x7x16xbf16, #tpu.memory_space<vmem>>, vector<1x7x7x16xbf16>
    %4 = vector.extract_strided_slice %0 {offsets = [0, 0, 0, 0], sizes = [1, 7, 7, 16], strides = [1, 1, 1, 1]} : vector<1x8x8x16xbf16> to vector<1x7x7x16xbf16>
    %5 = vector.extract_strided_slice %1 {offsets = [0, 0, 0, 0], sizes = [1, 7, 7, 16], strides = [1, 1, 1, 1]} : vector<1x8x7x16xbf16> to vector<1x7x7x16xbf16>
    %6 = vector.extract_strided_slice %0 {offsets = [0, 0, 1, 0], sizes = [1, 7, 7, 16], strides = [1, 1, 1, 1]} : vector<1x8x8x16xbf16> to vector<1x7x7x16xbf16>
    %7 = vector.extract_strided_slice %2 {offsets = [0, 0, 0, 0], sizes = [1, 7, 7, 16], strides = [1, 1, 1, 1]} : vector<1x7x8x16xbf16> to vector<1x7x7x16xbf16>
    %8 = vector.extract_strided_slice %2 {offsets = [0, 0, 1, 0], sizes = [1, 7, 7, 16], strides = [1, 1, 1, 1]} : vector<1x7x8x16xbf16> to vector<1x7x7x16xbf16>
    %9 = vector.extract_strided_slice %0 {offsets = [0, 1, 0, 0], sizes = [1, 7, 7, 16], strides = [1, 1, 1, 1]} : vector<1x8x8x16xbf16> to vector<1x7x7x16xbf16>
    %10 = vector.extract_strided_slice %1 {offsets = [0, 1, 0, 0], sizes = [1, 7, 7, 16], strides = [1, 1, 1, 1]} : vector<1x8x7x16xbf16> to vector<1x7x7x16xbf16>
    %11 = vector.extract_strided_slice %0 {offsets = [0, 1, 1, 0], sizes = [1, 7, 7, 16], strides = [1, 1, 1, 1]} : vector<1x8x8x16xbf16> to vector<1x7x7x16xbf16>
    %12 = arith.maximumf %4, %5 : vector<1x7x7x16xbf16>
    %13 = arith.maximumf %12, %6 : vector<1x7x7x16xbf16>
    %14 = arith.maximumf %13, %7 : vector<1x7x7x16xbf16>
    %15 = arith.maximumf %14, %3 : vector<1x7x7x16xbf16>
    %16 = arith.maximumf %15, %8 : vector<1x7x7x16xbf16>
    %17 = arith.maximumf %16, %9 : vector<1x7x7x16xbf16>
    %18 = arith.maximumf %17, %10 : vector<1x7x7x16xbf16>
    %19 = arith.maximumf %18, %11 : vector<1x7x7x16xbf16>
    %c0_15 = arith.constant 0 : index
    %c0_16 = arith.constant 0 : index
    %c0_17 = arith.constant 0 : index
    %c0_18 = arith.constant 0 : index
    %20 = vector.load %arg5[%c0_15, %c0_16, %c0_17, %c0_18] : memref<1x7x7x16xbf16, #tpu.memory_space<vmem>>, vector<1x7x7x16xbf16>
    tpu.vector_store %arg5[%c0_15, %c0_16, %c0_17, %c0_18], %19 {strides = array<i32>} : memref<1x7x7x16xbf16, #tpu.memory_space<vmem>>, vector<1x7x7x16xbf16>,
    return
  }
  func.func @transform_0(%arg0: i32) -> (i32, i32, i32, i32) {
    %c0_i32 = arith.constant 0 : i32
    %c0_i32_0 = arith.constant 0 : i32
    %c0_i32_1 = arith.constant 0 : i32
    %c0_i32_2 = arith.constant 0 : i32
    return %arg0, %c0_i32, %c0_i32_0, %c0_i32_1 : i32, i32, i32, i32
  }
  func.func @transform_1(%arg0: i32) -> (i32, i32, i32, i32) {
    %c0_i32 = arith.constant 0 : i32
    %c0_i32_0 = arith.constant 0 : i32
    %c0_i32_1 = arith.constant 0 : i32
    %c0_i32_2 = arith.constant 0 : i32
    return %arg0, %c0_i32, %c0_i32_0, %c0_i32_1 : i32, i32, i32, i32
  }
  func.func @transform_2(%arg0: i32) -> (i32, i32, i32, i32) {
    %c0_i32 = arith.constant 0 : i32
    %c0_i32_0 = arith.constant 0 : i32
    %c0_i32_1 = arith.constant 0 : i32
    %c0_i32_2 = arith.constant 0 : i32
    return %arg0, %c0_i32, %c0_i32_0, %c0_i32_1 : i32, i32, i32, i32
  }
  func.func @transform_3(%arg0: i32) -> (i32, i32, i32, i32) {
    %c0_i32 = arith.constant 0 : i32
    %c0_i32_0 = arith.constant 0 : i32
    %c0_i32_1 = arith.constant 0 : i32
    %c0_i32_2 = arith.constant 0 : i32
    return %arg0, %c0_i32, %c0_i32_0, %c0_i32_1 : i32, i32, i32, i32
  }
  func.func @transform_4(%arg0: i32) -> (i32, i32, i32, i32) {
    %c0_i32 = arith.constant 0 : i32
    %c0_i32_0 = arith.constant 0 : i32
    %c0_i32_1 = arith.constant 0 : i32
    %c0_i32_2 = arith.constant 0 : i32
    return %arg0, %c0_i32, %c0_i32_0, %c0_i32_1 : i32, i32, i32, i32
  }
}

module attributes {stable_mosaic.version = 11 : i64} {
  func.func @_matmul_bn_relu_kernel(%arg0: i32, %arg1: i32, %arg2: i32, %arg3: memref<112x128xbf16, #tpu.memory_space<vmem>>, %arg4: memref<128x128xbf16, #tpu.memory_space<vmem>>, %arg5: memref<1x128xf32, #tpu.memory_space<vmem>>, %arg6: memref<1x128xf32, #tpu.memory_space<vmem>>, %arg7: memref<112x128xbf16, #tpu.memory_space<vmem>>, %arg8: memref<112x128xf32, #tpu.memory_space<vmem>>) attributes {dimension_semantics = [#tpu.dimension_semantics<parallel>, #tpu.dimension_semantics<parallel>, #tpu.dimension_semantics<arbitrary>], iteration_bounds = array<i64: 1, 1, 1>, scalar_prefetch = 0 : i64, scratch_operands = 1 : i64, tpu.core_type = #tpu.core_type<tc>, window_params = [{transform_indices = @transform_0, window_bounds = array<i64: 112, 128>}, {transform_indices = @transform_1, window_bounds = array<i64: 128, 128>}, {transform_indices = @transform_2, window_bounds = array<i64: 1, 128>}, {transform_indices = @transform_3, window_bounds = array<i64: 1, 128>}, {transform_indices = @transform_4, window_bounds = array<i64: 112, 128>}]} {
    %c0_i32 = arith.constant 0 : i32
    %0 = arith.cmpi eq, %arg2, %c0_i32 : i32
    %1 = arith.extui %0 : i1 to i32
    %c0_i32_0 = arith.constant 0 : i32
    %2 = arith.cmpi ne, %1, %c0_i32_0 : i32
    scf.if %2 {
      %cst_10 = arith.constant 0.000000e+00 : f32
      %12 = vector.broadcast %cst_10 : f32 to vector<112x128xf32>
      %c0_11 = arith.constant 0 : index
      %c0_12 = arith.constant 0 : index
      %13 = vector.load %arg8[%c0_11, %c0_12] : memref<112x128xf32, #tpu.memory_space<vmem>>, vector<112x128xf32>
      tpu.vector_store %arg8[%c0_11, %c0_12], %12 {strides = array<i32>} : memref<112x128xf32, #tpu.memory_space<vmem>>, vector<112x128xf32>,
    } else {
    }
    %c0 = arith.constant 0 : index
    %c0_1 = arith.constant 0 : index
    %3 = vector.load %arg8[%c0, %c0_1] : memref<112x128xf32, #tpu.memory_space<vmem>>, vector<112x128xf32>
    %c0_2 = arith.constant 0 : index
    %c0_3 = arith.constant 0 : index
    %4 = vector.load %arg3[%c0_2, %c0_3] : memref<112x128xbf16, #tpu.memory_space<vmem>>, vector<112x128xbf16>
    %c0_4 = arith.constant 0 : index
    %c0_5 = arith.constant 0 : index
    %5 = vector.load %arg4[%c0_4, %c0_5] : memref<128x128xbf16, #tpu.memory_space<vmem>>, vector<128x128xbf16>
    %cst = arith.constant dense<0.000000e+00> : vector<112x128xf32>
    %6 = tpu.matmul %4, %5, %cst {dimension_numbers = #tpu.dot_dimension_numbers<[1], [0], [0], [1], [0, 0, 1, 1], [], []>} : vector<112x128xbf16>, vector<128x128xbf16>, vector<112x128xf32> -> vector<112x128xf32>
    %7 = arith.addf %3, %6 : vector<112x128xf32>
    %c0_6 = arith.constant 0 : index
    %c0_7 = arith.constant 0 : index
    %8 = vector.load %arg8[%c0_6, %c0_7] : memref<112x128xf32, #tpu.memory_space<vmem>>, vector<112x128xf32>
    tpu.vector_store %arg8[%c0_6, %c0_7], %7 {strides = array<i32>} : memref<112x128xf32, #tpu.memory_space<vmem>>, vector<112x128xf32>,
    %c0_i32_8 = arith.constant 0 : i32
    %9 = arith.cmpi eq, %arg2, %c0_i32_8 : i32
    %10 = arith.extui %9 : i1 to i32
    %c0_i32_9 = arith.constant 0 : i32
    %11 = arith.cmpi ne, %10, %c0_i32_9 : i32
    scf.if %11 {
      %c0_10 = arith.constant 0 : index
      %c0_11 = arith.constant 0 : index
      %12 = vector.load %arg8[%c0_10, %c0_11] : memref<112x128xf32, #tpu.memory_space<vmem>>, vector<112x128xf32>
      %c0_12 = arith.constant 0 : index
      %c0_13 = arith.constant 0 : index
      %13 = vector.load %arg5[%c0_12, %c0_13] : memref<1x128xf32, #tpu.memory_space<vmem>>, vector<1x128xf32>
      %14 = vector.broadcast %13 : vector<1x128xf32> to vector<112x128xf32>
      %15 = arith.mulf %12, %14 : vector<112x128xf32>
      %c0_14 = arith.constant 0 : index
      %c0_15 = arith.constant 0 : index
      %16 = vector.load %arg6[%c0_14, %c0_15] : memref<1x128xf32, #tpu.memory_space<vmem>>, vector<1x128xf32>
      %17 = vector.broadcast %16 : vector<1x128xf32> to vector<112x128xf32>
      %18 = arith.addf %15, %17 : vector<112x128xf32>
      %cst_16 = arith.constant 0.000000e+00 : f32
      %19 = vector.broadcast %cst_16 : f32 to vector<112x128xf32>
      %20 = arith.maximumf %18, %19 : vector<112x128xf32>
      %21 = arith.truncf %20 : vector<112x128xf32> to vector<112x128xbf16>
      %c0_17 = arith.constant 0 : index
      %c0_18 = arith.constant 0 : index
      %22 = vector.load %arg7[%c0_17, %c0_18] : memref<112x128xbf16, #tpu.memory_space<vmem>>, vector<112x128xbf16>
      tpu.vector_store %arg7[%c0_17, %c0_18], %21 {strides = array<i32>} : memref<112x128xbf16, #tpu.memory_space<vmem>>, vector<112x128xbf16>,
    } else {
    }
    return
  }
  func.func @transform_0(%arg0: i32, %arg1: i32, %arg2: i32) -> (i32, i32) {
    %c0_i32 = arith.constant 0 : i32
    return %arg0, %arg2 : i32, i32
  }
  func.func @transform_1(%arg0: i32, %arg1: i32, %arg2: i32) -> (i32, i32) {
    %c0_i32 = arith.constant 0 : i32
    return %arg2, %arg1 : i32, i32
  }
  func.func @transform_2(%arg0: i32, %arg1: i32, %arg2: i32) -> (i32, i32) {
    %c0_i32 = arith.constant 0 : i32
    %c0_i32_0 = arith.constant 0 : i32
    return %c0_i32, %arg1 : i32, i32
  }
  func.func @transform_3(%arg0: i32, %arg1: i32, %arg2: i32) -> (i32, i32) {
    %c0_i32 = arith.constant 0 : i32
    %c0_i32_0 = arith.constant 0 : i32
    return %c0_i32, %arg1 : i32, i32
  }
  func.func @transform_4(%arg0: i32, %arg1: i32, %arg2: i32) -> (i32, i32) {
    %c0_i32 = arith.constant 0 : i32
    return %arg0, %arg1 : i32, i32
  }
}

module attributes {stable_mosaic.version = 11 : i64} {
  func.func @_matmul_bn_relu_kernel(%arg0: i32, %arg1: i32, %arg2: i32, %arg3: memref<112x256xbf16, #tpu.memory_space<vmem>>, %arg4: memref<256x128xbf16, #tpu.memory_space<vmem>>, %arg5: memref<1x128xf32, #tpu.memory_space<vmem>>, %arg6: memref<1x128xf32, #tpu.memory_space<vmem>>, %arg7: memref<112x128xbf16, #tpu.memory_space<vmem>>, %arg8: memref<112x128xf32, #tpu.memory_space<vmem>>) attributes {dimension_semantics = [#tpu.dimension_semantics<parallel>, #tpu.dimension_semantics<parallel>, #tpu.dimension_semantics<arbitrary>], iteration_bounds = array<i64: 1, 1, 1>, scalar_prefetch = 0 : i64, scratch_operands = 1 : i64, tpu.core_type = #tpu.core_type<tc>, window_params = [{transform_indices = @transform_0, window_bounds = array<i64: 112, 256>}, {transform_indices = @transform_1, window_bounds = array<i64: 256, 128>}, {transform_indices = @transform_2, window_bounds = array<i64: 1, 128>}, {transform_indices = @transform_3, window_bounds = array<i64: 1, 128>}, {transform_indices = @transform_4, window_bounds = array<i64: 112, 128>}]} {
    %c0_i32 = arith.constant 0 : i32
    %0 = arith.cmpi eq, %arg2, %c0_i32 : i32
    %1 = arith.extui %0 : i1 to i32
    %c0_i32_0 = arith.constant 0 : i32
    %2 = arith.cmpi ne, %1, %c0_i32_0 : i32
    scf.if %2 {
      %cst_10 = arith.constant 0.000000e+00 : f32
      %12 = vector.broadcast %cst_10 : f32 to vector<112x128xf32>
      %c0_11 = arith.constant 0 : index
      %c0_12 = arith.constant 0 : index
      %13 = vector.load %arg8[%c0_11, %c0_12] : memref<112x128xf32, #tpu.memory_space<vmem>>, vector<112x128xf32>
      tpu.vector_store %arg8[%c0_11, %c0_12], %12 {strides = array<i32>} : memref<112x128xf32, #tpu.memory_space<vmem>>, vector<112x128xf32>,
    } else {
    }
    %c0 = arith.constant 0 : index
    %c0_1 = arith.constant 0 : index
    %3 = vector.load %arg8[%c0, %c0_1] : memref<112x128xf32, #tpu.memory_space<vmem>>, vector<112x128xf32>
    %c0_2 = arith.constant 0 : index
    %c0_3 = arith.constant 0 : index
    %4 = vector.load %arg3[%c0_2, %c0_3] : memref<112x256xbf16, #tpu.memory_space<vmem>>, vector<112x256xbf16>
    %c0_4 = arith.constant 0 : index
    %c0_5 = arith.constant 0 : index
    %5 = vector.load %arg4[%c0_4, %c0_5] : memref<256x128xbf16, #tpu.memory_space<vmem>>, vector<256x128xbf16>
    %cst = arith.constant dense<0.000000e+00> : vector<112x128xf32>
    %6 = tpu.matmul %4, %5, %cst {dimension_numbers = #tpu.dot_dimension_numbers<[1], [0], [0], [1], [0, 0, 1, 1], [], []>} : vector<112x256xbf16>, vector<256x128xbf16>, vector<112x128xf32> -> vector<112x128xf32>
    %7 = arith.addf %3, %6 : vector<112x128xf32>
    %c0_6 = arith.constant 0 : index
    %c0_7 = arith.constant 0 : index
    %8 = vector.load %arg8[%c0_6, %c0_7] : memref<112x128xf32, #tpu.memory_space<vmem>>, vector<112x128xf32>
    tpu.vector_store %arg8[%c0_6, %c0_7], %7 {strides = array<i32>} : memref<112x128xf32, #tpu.memory_space<vmem>>, vector<112x128xf32>,
    %c0_i32_8 = arith.constant 0 : i32
    %9 = arith.cmpi eq, %arg2, %c0_i32_8 : i32
    %10 = arith.extui %9 : i1 to i32
    %c0_i32_9 = arith.constant 0 : i32
    %11 = arith.cmpi ne, %10, %c0_i32_9 : i32
    scf.if %11 {
      %c0_10 = arith.constant 0 : index
      %c0_11 = arith.constant 0 : index
      %12 = vector.load %arg8[%c0_10, %c0_11] : memref<112x128xf32, #tpu.memory_space<vmem>>, vector<112x128xf32>
      %c0_12 = arith.constant 0 : index
      %c0_13 = arith.constant 0 : index
      %13 = vector.load %arg5[%c0_12, %c0_13] : memref<1x128xf32, #tpu.memory_space<vmem>>, vector<1x128xf32>
      %14 = vector.broadcast %13 : vector<1x128xf32> to vector<112x128xf32>
      %15 = arith.mulf %12, %14 : vector<112x128xf32>
      %c0_14 = arith.constant 0 : index
      %c0_15 = arith.constant 0 : index
      %16 = vector.load %arg6[%c0_14, %c0_15] : memref<1x128xf32, #tpu.memory_space<vmem>>, vector<1x128xf32>
      %17 = vector.broadcast %16 : vector<1x128xf32> to vector<112x128xf32>
      %18 = arith.addf %15, %17 : vector<112x128xf32>
      %cst_16 = arith.constant 0.000000e+00 : f32
      %19 = vector.broadcast %cst_16 : f32 to vector<112x128xf32>
      %20 = arith.maximumf %18, %19 : vector<112x128xf32>
      %21 = arith.truncf %20 : vector<112x128xf32> to vector<112x128xbf16>
      %c0_17 = arith.constant 0 : index
      %c0_18 = arith.constant 0 : index
      %22 = vector.load %arg7[%c0_17, %c0_18] : memref<112x128xbf16, #tpu.memory_space<vmem>>, vector<112x128xbf16>
      tpu.vector_store %arg7[%c0_17, %c0_18], %21 {strides = array<i32>} : memref<112x128xbf16, #tpu.memory_space<vmem>>, vector<112x128xbf16>,
    } else {
    }
    return
  }
  func.func @transform_0(%arg0: i32, %arg1: i32, %arg2: i32) -> (i32, i32) {
    %c0_i32 = arith.constant 0 : i32
    return %arg0, %arg2 : i32, i32
  }
  func.func @transform_1(%arg0: i32, %arg1: i32, %arg2: i32) -> (i32, i32) {
    %c0_i32 = arith.constant 0 : i32
    return %arg2, %arg1 : i32, i32
  }
  func.func @transform_2(%arg0: i32, %arg1: i32, %arg2: i32) -> (i32, i32) {
    %c0_i32 = arith.constant 0 : i32
    %c0_i32_0 = arith.constant 0 : i32
    return %c0_i32, %arg1 : i32, i32
  }
  func.func @transform_3(%arg0: i32, %arg1: i32, %arg2: i32) -> (i32, i32) {
    %c0_i32 = arith.constant 0 : i32
    %c0_i32_0 = arith.constant 0 : i32
    return %c0_i32, %arg1 : i32, i32
  }
  func.func @transform_4(%arg0: i32, %arg1: i32, %arg2: i32) -> (i32, i32) {
    %c0_i32 = arith.constant 0 : i32
    return %arg0, %arg1 : i32, i32
  }
}

module attributes {stable_mosaic.version = 11 : i64} {
  func.func @_avgpool_3x3_s1_kernel(%arg0: i32, %arg1: memref<1x9x9x16xbf16, #tpu.memory_space<vmem>>, %arg2: memref<1x7x7x16xbf16, #tpu.memory_space<vmem>>) attributes {dimension_semantics = [#tpu.dimension_semantics<parallel>], iteration_bounds = array<i64: 2>, scalar_prefetch = 0 : i64, scratch_operands = 0 : i64, tpu.core_type = #tpu.core_type<tc>, window_params = [{transform_indices = @transform_0, window_bounds = array<i64: 1, 9, 9, 16>}, {transform_indices = @transform_1, window_bounds = array<i64: 1, 7, 7, 16>}]} {
    %c0 = arith.constant 0 : index
    %c0_0 = arith.constant 0 : index
    %c0_1 = arith.constant 0 : index
    %c0_2 = arith.constant 0 : index
    %0 = vector.load %arg1[%c0, %c0_0, %c0_1, %c0_2] : memref<1x9x9x16xbf16, #tpu.memory_space<vmem>>, vector<1x9x9x16xbf16>
    %1 = arith.extf %0 : vector<1x9x9x16xbf16> to vector<1x9x9x16xf32>
    %2 = vector.extract_strided_slice %1 {offsets = [0, 0, 0, 0], sizes = [1, 7, 7, 16], strides = [1, 1, 1, 1]} : vector<1x9x9x16xf32> to vector<1x7x7x16xf32>
    %3 = vector.extract_strided_slice %1 {offsets = [0, 0, 1, 0], sizes = [1, 7, 7, 16], strides = [1, 1, 1, 1]} : vector<1x9x9x16xf32> to vector<1x7x7x16xf32>
    %4 = arith.addf %2, %3 : vector<1x7x7x16xf32>
    %5 = vector.extract_strided_slice %1 {offsets = [0, 0, 2, 0], sizes = [1, 7, 7, 16], strides = [1, 1, 1, 1]} : vector<1x9x9x16xf32> to vector<1x7x7x16xf32>
    %6 = arith.addf %4, %5 : vector<1x7x7x16xf32>
    %7 = vector.extract_strided_slice %1 {offsets = [0, 1, 0, 0], sizes = [1, 7, 7, 16], strides = [1, 1, 1, 1]} : vector<1x9x9x16xf32> to vector<1x7x7x16xf32>
    %8 = arith.addf %6, %7 : vector<1x7x7x16xf32>
    %9 = vector.extract_strided_slice %1 {offsets = [0, 1, 1, 0], sizes = [1, 7, 7, 16], strides = [1, 1, 1, 1]} : vector<1x9x9x16xf32> to vector<1x7x7x16xf32>
    %10 = arith.addf %8, %9 : vector<1x7x7x16xf32>
    %11 = vector.extract_strided_slice %1 {offsets = [0, 1, 2, 0], sizes = [1, 7, 7, 16], strides = [1, 1, 1, 1]} : vector<1x9x9x16xf32> to vector<1x7x7x16xf32>
    %12 = arith.addf %10, %11 : vector<1x7x7x16xf32>
    %13 = vector.extract_strided_slice %1 {offsets = [0, 2, 0, 0], sizes = [1, 7, 7, 16], strides = [1, 1, 1, 1]} : vector<1x9x9x16xf32> to vector<1x7x7x16xf32>
    %14 = arith.addf %12, %13 : vector<1x7x7x16xf32>
    %15 = vector.extract_strided_slice %1 {offsets = [0, 2, 1, 0], sizes = [1, 7, 7, 16], strides = [1, 1, 1, 1]} : vector<1x9x9x16xf32> to vector<1x7x7x16xf32>
    %16 = arith.addf %14, %15 : vector<1x7x7x16xf32>
    %17 = vector.extract_strided_slice %1 {offsets = [0, 2, 2, 0], sizes = [1, 7, 7, 16], strides = [1, 1, 1, 1]} : vector<1x9x9x16xf32> to vector<1x7x7x16xf32>
    %18 = arith.addf %16, %17 : vector<1x7x7x16xf32>
    %cst = arith.constant 0.111111112 : f32
    %19 = vector.broadcast %cst : f32 to vector<1x7x7x16xf32>
    %20 = arith.mulf %18, %19 : vector<1x7x7x16xf32>
    %21 = arith.truncf %20 : vector<1x7x7x16xf32> to vector<1x7x7x16xbf16>
    %c0_3 = arith.constant 0 : index
    %c0_4 = arith.constant 0 : index
    %c0_5 = arith.constant 0 : index
    %c0_6 = arith.constant 0 : index
    %22 = vector.load %arg2[%c0_3, %c0_4, %c0_5, %c0_6] : memref<1x7x7x16xbf16, #tpu.memory_space<vmem>>, vector<1x7x7x16xbf16>
    tpu.vector_store %arg2[%c0_3, %c0_4, %c0_5, %c0_6], %21 {strides = array<i32>} : memref<1x7x7x16xbf16, #tpu.memory_space<vmem>>, vector<1x7x7x16xbf16>,
    return
  }
  func.func @transform_0(%arg0: i32) -> (i32, i32, i32, i32) {
    %c0_i32 = arith.constant 0 : i32
    %c0_i32_0 = arith.constant 0 : i32
    %c0_i32_1 = arith.constant 0 : i32
    %c0_i32_2 = arith.constant 0 : i32
    return %arg0, %c0_i32, %c0_i32_0, %c0_i32_1 : i32, i32, i32, i32
  }
  func.func @transform_1(%arg0: i32) -> (i32, i32, i32, i32) {
    %c0_i32 = arith.constant 0 : i32
    %c0_i32_0 = arith.constant 0 : i32
    %c0_i32_1 = arith.constant 0 : i32
    %c0_i32_2 = arith.constant 0 : i32
    return %arg0, %c0_i32, %c0_i32_0, %c0_i32_1 : i32, i32, i32, i32
  }
}

module attributes {stable_mosaic.version = 11 : i64} {
  func.func @_head_kernel(%arg0: memref<8x49x128xbf16, #tpu.memory_space<vmem>>, %arg1: memref<128x384xf32, #tpu.memory_space<vmem>>, %arg2: memref<1x384xf32, #tpu.memory_space<vmem>>, %arg3: memref<8x384xf32, #tpu.memory_space<vmem>>) attributes {dimension_semantics = [], scalar_prefetch = 0 : i64, scratch_operands = 0 : i64, tpu.core_type = #tpu.core_type<tc>} {
    %c0 = arith.constant 0 : index
    %c0_0 = arith.constant 0 : index
    %c0_1 = arith.constant 0 : index
    %0 = vector.load %arg0[%c0, %c0_0, %c0_1] : memref<8x49x128xbf16, #tpu.memory_space<vmem>>, vector<8x49x128xbf16>
    %1 = arith.extf %0 : vector<8x49x128xbf16> to vector<8x49x128xf32>
    %cst = arith.constant dense<0.000000e+00> : vector<8x128xf32>
    %2 = vector.multi_reduction <add>, %1, %cst [1] : vector<8x49x128xf32> to vector<8x128xf32>
    %c0_2 = arith.constant 0 : index
    %c0_3 = arith.constant 0 : index
    %3 = vector.load %arg1[%c0_2, %c0_3] : memref<128x384xf32, #tpu.memory_space<vmem>>, vector<128x384xf32>
    %cst_4 = arith.constant dense<0.000000e+00> : vector<8x384xf32>
    %4 = tpu.matmul %2, %3, %cst_4 {dimension_numbers = #tpu.dot_dimension_numbers<[1], [0], [0], [1], [0, 0, 1, 1], [], []>} : vector<8x128xf32>, vector<128x384xf32>, vector<8x384xf32> -> vector<8x384xf32>
    %c0_5 = arith.constant 0 : index
    %c0_6 = arith.constant 0 : index
    %5 = vector.load %arg2[%c0_5, %c0_6] : memref<1x384xf32, #tpu.memory_space<vmem>>, vector<1x384xf32>
    %6 = vector.broadcast %5 : vector<1x384xf32> to vector<8x384xf32>
    %7 = arith.addf %4, %6 : vector<8x384xf32>
    %c0_7 = arith.constant 0 : index
    %c0_8 = arith.constant 0 : index
    %8 = vector.load %arg3[%c0_7, %c0_8] : memref<8x384xf32, #tpu.memory_space<vmem>>, vector<8x384xf32>
    tpu.vector_store %arg3[%c0_7, %c0_8], %7 {strides = array<i32>} : memref<8x384xf32, #tpu.memory_space<vmem>>, vector<8x384xf32>,
    return
  }
}

</mosaic_0001>

<bundles_post_ra>
// kernel: inception_forward.10
= control target key start
LH: loop header
LB: loop body
LE: loop exit
PB: predicated region body
PF: predicated region fallthrough
CT: control target
= control target key end

     0   :  { %v1910_v0 = vmov 0.0   ;;  %vm1911_vm0 = vmmov 0   ;;  %s2335_s1 = inlined_call_operand.vmem [shape: bf16[128,128], index: 1, kind: input, shape index: {}]   ;;  %s2336_s0 = inlined_call_operand.vmem [shape: bf16[464,128], index: 0, kind: input, shape index: {}]   ;;  %s2337_s2 = inlined_call_operand.vmem [shape: f32[1,128], index: 2, kind: input, shape index: {}]   ;;  %s2338_s3 = inlined_call_operand.vmem [shape: f32[1,128], index: 3, kind: input, shape index: {}]   ;;  %s2339_s4 = inlined_call_operand.vmem [shape: bf16[464,128], index: 4, kind: output, shape index: {}]  }
   0x1   :  { %1723 = vmatprep.subr.bf16.mxu0 %v1910_v0  ;;  %v1873_v1 = vld [vmem:[%s2335_s1 + $0x38] sm:$0xff]   ;;  %1855 = vmatprep.subr.bf16.mxu1 %v1910_v0  ;;  %v1874_v2 = vld [vmem:[%s2335_s1 + $0x30] sm:$0xff]   ;;  %v1875_v3 = vld [vmem:[%s2335_s1 + $0x28] sm:$0xff]  }
   0x2   :  { %1739 = vmatprep.mubr.msk.bf16.mxu0 %vm1911_vm0, %v1910_v0  ;;  %1799 = vmatprep.mubr.msk.bf16.mxu1 %vm1911_vm0, %v1910_v0  ;;  %v1876_v4 = vld [vmem:[%s2335_s1 + $0x20] sm:$0xff]   ;;  %v1877_v5 = vld [vmem:[%s2335_s1 + $0x18] sm:$0xff]   ;;  %v1878_v6 = vld [vmem:[%s2335_s1 + $0x10] sm:$0xff]  }
   0x3   :  { %1724 = vmatpush3.bf16.msra.mxu0 %v1873_v1  ;;  %1863 = vmatpush3.bf16.msra.mxu1 %v1873_v1  ;;  %v1879_v7 = vld [vmem:[%s2335_s1 + $0x8] sm:$0xff]   ;;  %v1880_v8 = vld [vmem:[%s2335_s1] sm:$0xff]   ;;  %v1882_v10 = vld [vmem:[%s2336_s0 + $0x78] sm:$0xff]  }
   0x4   :  { %1725 = vmatprep.subr.bf16.mxu0 %v1910_v0  ;;  %1856 = vmatprep.subr.bf16.mxu1 %v1910_v0  ;;  %v1881_v9 = vld [vmem:[%s2336_s0] sm:$0xff]   ;;  %v1883_v11 = vld [vmem:[%s2336_s0 + $0x8] sm:$0xff]   ;;  %v1885_v13 = vld [vmem:[%s2336_s0 + $0x10] sm:$0xff]  }
   0x5   :  { %v1884_v12 = vld [vmem:[%s2336_s0 + $0x80] sm:$0xff]   ;;  %v1886_v14 = vld [vmem:[%s2336_s0 + $0x88] sm:$0xff]   ;;  %v1887_v15 = vld [vmem:[%s2336_s0 + $0x18] sm:$0xff]  }
   0x6   :  { %v1888_v16 = vld [vmem:[%s2336_s0 + $0x90] sm:$0xff]   ;;  %v1889_v17 = vld [vmem:[%s2336_s0 + $0x20] sm:$0xff]   ;;  %v1890_v18 = vld [vmem:[%s2336_s0 + $0x98] sm:$0xff]  }
   0x7   :  { %1726 = vmatpush3.bf16.msra.mxu0 %v1874_v2  ;;  %1864 = vmatpush3.bf16.msra.mxu1 %v1874_v2  ;;  %v1891_v19 = vld [vmem:[%s2336_s0 + $0x28] sm:$0xff]   ;;  %v1892_v20 = vld [vmem:[%s2336_s0 + $0xa0] sm:$0xff]   ;;  %v1893_v21 = vld [vmem:[%s2336_s0 + $0x30] sm:$0xff]  }
   0x8   :  { %1727 = vmatprep.subr.bf16.mxu0 %v1910_v0  ;;  %1857 = vmatprep.subr.bf16.mxu1 %v1910_v0  ;;  %v1894_v22 = vld [vmem:[%s2336_s0 + $0xa8] sm:$0xff]   ;;  %v1895_v23 = vld [vmem:[%s2336_s0 + $0x38] sm:$0xff]   ;;  %v1896_v24 = vld [vmem:[%s2336_s0 + $0xb0] sm:$0xff]  }
   0x9   :  { %v1897_v25 = vld [vmem:[%s2336_s0 + $0x40] sm:$0xff]   ;;  %v1898_v26 = vld [vmem:[%s2336_s0 + $0xb8] sm:$0xff]   ;;  %v1899_v27 = vld [vmem:[%s2336_s0 + $0x48] sm:$0xff]  }
   0xa   :  { %v1900_v28 = vld [vmem:[%s2336_s0 + $0xc0] sm:$0xff]   ;;  %v1901_v29 = vld [vmem:[%s2336_s0 + $0x50] sm:$0xff]   ;;  %v1902_v30 = vld [vmem:[%s2336_s0 + $0xc8] sm:$0xff]  }
   0xb   :  { %1728 = vmatpush3.bf16.msra.mxu0 %v1875_v3  ;;  %1865 = vmatpush3.bf16.msra.mxu1 %v1875_v3  ;;  %v1903_v31 = vld [vmem:[%s2336_s0 + $0x58] sm:$0xff]   ;;  %v1904_v32 = vld [vmem:[%s2336_s0 + $0xd0] sm:$0xff]   ;;  %v1905_v33 = vld [vmem:[%s2336_s0 + $0x60] sm:$0xff]  }
   0xc   :  { %1729 = vmatprep.subr.bf16.mxu0 %v1910_v0  ;;  %1858 = vmatprep.subr.bf16.mxu1 %v1910_v0  ;;  %v1906_v34 = vld [vmem:[%s2336_s0 + $0xd8] sm:$0xff]   ;;  %v1907_v35 = vld [vmem:[%s2336_s0 + $0x68] sm:$0xff]   ;;  %v1908_v36 = vld [vmem:[%s2336_s0 + $0xe0] sm:$0xff]  }
   0xd   :  { %v1909_v37 = vld [vmem:[%s2336_s0 + $0x70] sm:$0xff]   ;;  %v2125_v38 = vld [vmem:[%s2337_s2] ss:$0 sm:$0xff] }
   0xe   :  { %v2131_v42 = vld [vmem:[%s2338_s3] ss:$0 sm:$0xff] }
   0xf   :  { %1730 = vmatpush3.bf16.msra.mxu0 %v1876_v4  ;;  %1866 = vmatpush3.bf16.msra.mxu1 %v1876_v4 }
  0x10   :  { %1731 = vmatprep.subr.bf16.mxu0 %v1910_v0  ;;  %1859 = vmatprep.subr.bf16.mxu1 %v1910_v0 }
  0x13   :  { %1732 = vmatpush3.bf16.msra.mxu0 %v1877_v5  ;;  %1867 = vmatpush3.bf16.msra.mxu1 %v1877_v5 }
  0x14   :  { %1733 = vmatprep.subr.bf16.mxu0 %v1910_v0  ;;  %1860 = vmatprep.subr.bf16.mxu1 %v1910_v0 }
  0x17   :  { %1734 = vmatpush3.bf16.msra.mxu0 %v1878_v6  ;;  %1868 = vmatpush3.bf16.msra.mxu1 %v1878_v6 }
  0x18   :  { %1735 = vmatprep.subr.bf16.mxu0 %v1910_v0  ;;  %1861 = vmatprep.subr.bf16.mxu1 %v1910_v0 }
  0x1b   :  { %1736 = vmatpush3.bf16.msra.mxu0 %v1879_v7  ;;  %1869 = vmatpush3.bf16.msra.mxu1 %v1879_v7 }
  0x1c   :  { %1737 = vmatprep.subr.bf16.mxu0 %v1910_v0  ;;  %1862 = vmatprep.subr.bf16.mxu1 %v1910_v0 }
  0x1f   :  { %1738 = vmatpush3.bf16.msra.mxu0 %v1880_v8  ;;  %1870 = vmatpush3.bf16.msra.mxu1 %v1880_v8 }
  0x22   :  { %1740 = vmatmul.mubr.bf16.vlgmr.msra.gmra.mxu0 %v1881_v9  ;;  %1800 = vmatmul.mubr.bf16.vlgmr.msra.gmra.mxu1 %v1882_v10 }
  0x23   :  { %1743 = vmatprep.mubr.msk.bf16.mxu0 %vm1911_vm0, %v1910_v0  ;;  %1803 = vmatprep.mubr.msk.bf16.mxu1 %vm1911_vm0, %v1910_v0 }
  0x2a   :  { %1744 = vmatmul.mubr.bf16.gmra.mxu0 %v1883_v11  ;;  %1804 = vmatmul.mubr.bf16.gmra.mxu1 %v1884_v12 }
  0x2b   :  { %1747 = vmatprep.mubr.msk.bf16.mxu0 %vm1911_vm0, %v1910_v0  ;;  %1807 = vmatprep.mubr.msk.bf16.mxu1 %vm1911_vm0, %v1910_v0 }
  0x32   :  { %1748 = vmatmul.mubr.bf16.gmra.mxu0 %v1885_v13  ;;  %1808 = vmatmul.mubr.bf16.gmra.mxu1 %v1886_v14 }
  0x33   :  { %1751 = vmatprep.mubr.msk.bf16.mxu0 %vm1911_vm0, %v1910_v0  ;;  %1811 = vmatprep.mubr.msk.bf16.mxu1 %vm1911_vm0, %v1910_v0 }
  0x3a   :  { %1752 = vmatmul.mubr.bf16.gmra.mxu0 %v1887_v15  ;;  %1812 = vmatmul.mubr.bf16.gmra.mxu1 %v1888_v16 }
  0x3b   :  { %1755 = vmatprep.mubr.msk.bf16.mxu0 %vm1911_vm0, %v1910_v0  ;;  %1815 = vmatprep.mubr.msk.bf16.mxu1 %vm1911_vm0, %v1910_v0 }
  0x42   :  { %1756 = vmatmul.mubr.bf16.gmra.mxu0 %v1889_v17  ;;  %1816 = vmatmul.mubr.bf16.gmra.mxu1 %v1890_v18 }
  0x43   :  { %1759 = vmatprep.mubr.msk.bf16.mxu0 %vm1911_vm0, %v1910_v0  ;;  %1819 = vmatprep.mubr.msk.bf16.mxu1 %vm1911_vm0, %v1910_v0 }
  0x4a   :  { %1760 = vmatmul.mubr.bf16.gmra.mxu0 %v1891_v19  ;;  %1820 = vmatmul.mubr.bf16.gmra.mxu1 %v1892_v20 }
  0x4b   :  { %1763 = vmatprep.mubr.msk.bf16.mxu0 %vm1911_vm0, %v1910_v0  ;;  %1823 = vmatprep.mubr.msk.bf16.mxu1 %vm1911_vm0, %v1910_v0 }
  0x52   :  { %1764 = vmatmul.mubr.bf16.gmra.mxu0 %v1893_v21  ;;  %1824 = vmatmul.mubr.bf16.gmra.mxu1 %v1894_v22 }
  0x53   :  { %1767 = vmatprep.mubr.msk.bf16.mxu0 %vm1911_vm0, %v1910_v0  ;;  %1827 = vmatprep.mubr.msk.bf16.mxu1 %vm1911_vm0, %v1910_v0 }
  0x5a   :  { %1768 = vmatmul.mubr.bf16.gmra.mxu0 %v1895_v23  ;;  %1828 = vmatmul.mubr.bf16.gmra.mxu1 %v1896_v24 }
  0x5b   :  { %1771 = vmatprep.mubr.msk.bf16.mxu0 %vm1911_vm0, %v1910_v0  ;;  %1831 = vmatprep.mubr.msk.bf16.mxu1 %vm1911_vm0, %v1910_v0 }
  0x62   :  { %1772 = vmatmul.mubr.bf16.gmra.mxu0 %v1897_v25  ;;  %1832 = vmatmul.mubr.bf16.gmra.mxu1 %v1898_v26 }
  0x63   :  { %1775 = vmatprep.mubr.msk.bf16.mxu0 %vm1911_vm0, %v1910_v0  ;;  %1835 = vmatprep.mubr.msk.bf16.mxu1 %vm1911_vm0, %v1910_v0 }
  0x6a   :  { %1776 = vmatmul.mubr.bf16.gmra.mxu0 %v1899_v27  ;;  %1836 = vmatmul.mubr.bf16.gmra.mxu1 %v1900_v28 }
  0x6b   :  { %1779 = vmatprep.mubr.msk.bf16.mxu0 %vm1911_vm0, %v1910_v0  ;;  %1839 = vmatprep.mubr.msk.bf16.mxu1 %vm1911_vm0, %v1910_v0 }
  0x72   :  { %1780 = vmatmul.mubr.bf16.gmra.mxu0 %v1901_v29  ;;  %1840 = vmatmul.mubr.bf16.gmra.mxu1 %v1902_v30 }
  0x73   :  { %1783 = vmatprep.mubr.msk.bf16.mxu0 %vm1911_vm0, %v1910_v0  ;;  %1843 = vmatprep.mubr.msk.bf16.mxu1 %vm1911_vm0, %v1910_v0 }
  0x7a   :  { %1784 = vmatmul.mubr.bf16.gmra.mxu0 %v1903_v31  ;;  %1844 = vmatmul.mubr.bf16.gmra.mxu1 %v1904_v32 }
  0x7b   :  { %1787 = vmatprep.mubr.msk.bf16.mxu0 %vm1911_vm0, %v1910_v0  ;;  %1847 = vmatprep.mubr.msk.bf16.mxu1 %vm1911_vm0, %v1910_v0 }
  0x82   :  { %1788 = vmatmul.mubr.bf16.gmra.mxu0 %v1905_v33  ;;  %1848 = vmatmul.mubr.bf16.gmra.mxu1 %v1906_v34 }
  0x83   :  { %1791 = vmatprep.mubr.msk.bf16.mxu0 %vm1911_vm0, %v1910_v0  ;;  %1851 = vmatprep.mubr.msk.bf16.mxu1 %vm1911_vm0, %v1910_v0 }
  0x8a   :  { %1792 = vmatmul.mubr.bf16.gmra.mxu0 %v1907_v35  ;;  %1852 = vmatmul.mubr.bf16.gmra.mxu1 %v1908_v36 }
  0x8b   :  { %1795 = vmatprep.mubr.msk.bf16.mxu0 %vm1911_vm0, %v1910_v0 }
  0x92   :  { %1796 = vmatmul.mubr.bf16.gmra.mxu0 %v1909_v37 }
  0xe2   :  { %v468_v39 = vpop.f32.mrf.mxu0  ;;  %v588_v40 = vpop.f32.mrf.mxu1 }
  0xe3   :  { %v883_v41 = vmul.f32 %v2125_v38, %v468_v39  ;;  %v913_v43 = vmul.f32 %v2125_v38, %v588_v40 }
  0xe4   :  { %v1741_v44 = vpop.f32.mrf.mxu0  ;;  %v1801_v45 = vpop.f32.mrf.mxu1 }
  0xe5   :  { %v978_v46 = vadd.f32 %v2131_v42, %v913_v43  ;;  %v948_v47 = vadd.f32 %v2131_v42, %v883_v41 }
  0xe6   :  { %v471_v48 = vpop.f32.mrf.mxu0  ;;  %v591_v49 = vpop.f32.mrf.mxu1 }
  0xe7   :  { %v884_v50 = vmul.f32 %v2125_v38, %v471_v48  ;;  %v914_v51 = vmul.f32 %v2125_v38, %v591_v49  ;;  %v1036_v54 = vmax.f32 %v978_v46, 0.0  ;;  %v1006_v57 = vmax.f32 %v948_v47, 0.0 }
  0xe8   :  { %v1742_v52 = vpop.f32.mrf.mxu0  ;;  %v1802_v53 = vpop.f32.mrf.mxu1 }
  0xe9   :  { %v949_v55 = vadd.f32 %v2131_v42, %v884_v50  ;;  %v979_v56 = vadd.f32 %v2131_v42, %v914_v51 }
  0xea   :  { %v476_v58 = vpop.f32.mrf.mxu0  ;;  %v596_v59 = vpop.f32.mrf.mxu1 }
  0xeb   :  { %v1007_v60 = vmax.f32 %v949_v55, 0.0  ;;  %v1037_v61 = vmax.f32 %v979_v56, 0.0  ;;  %v885_v62 = vmul.f32 %v2125_v38, %v476_v58  ;;  %v915_v63 = vmul.f32 %v2125_v38, %v596_v59 }
  0xec   :  { %v1745_v0 = vpop.f32.mrf.mxu0  ;;  %v1805_v1 = vpop.f32.mrf.mxu1 }
  0xed   :  { %v1516_v2 = vpack.c.bf16 %v1007_v60, %v1006_v57  ;;  %v1591_v3 = vpack.c.bf16 %v1037_v61, %v1036_v54  ;;  %v980_v4 = vadd.f32 %v2131_v42, %v915_v63  ;;  %v950_v5 = vadd.f32 %v2131_v42, %v885_v62 }
  0xee   :  { %v479_v6 = vpop.f32.mrf.mxu0  ;;  %v599_v7 = vpop.f32.mrf.mxu1 }
  0xef   :  { %1517 = vst [vmem:[%s2339_s4] sm:$0xff] %v1516_v2   ;;  %1672 = vst [vmem:[%s2339_s4 + $0x78] sm:$0xff] %v1591_v3   ;;  %v886_v8 = vmul.f32 %v2125_v38, %v479_v6  ;;  %v916_v9 = vmul.f32 %v2125_v38, %v599_v7  ;;  %v1038_v12 = vmax.f32 %v980_v4, 0.0  ;;  %v1008_v15 = vmax.f32 %v950_v5, 0.0 }
  0xf0   :  { %v1746_v10 = vpop.f32.mrf.mxu0  ;;  %v1806_v11 = vpop.f32.mrf.mxu1 }
  0xf1   :  { %v951_v13 = vadd.f32 %v2131_v42, %v886_v8  ;;  %v981_v14 = vadd.f32 %v2131_v42, %v916_v9 }
  0xf2   :  { %v484_v16 = vpop.f32.mrf.mxu0  ;;  %v604_v17 = vpop.f32.mrf.mxu1 }
  0xf3   :  { %v1009_v18 = vmax.f32 %v951_v13, 0.0  ;;  %v1039_v19 = vmax.f32 %v981_v14, 0.0  ;;  %v887_v20 = vmul.f32 %v2125_v38, %v484_v16  ;;  %v917_v21 = vmul.f32 %v2125_v38, %v604_v17 }
  0xf4   :  { %v1749_v22 = vpop.f32.mrf.mxu0  ;;  %v1809_v23 = vpop.f32.mrf.mxu1 }
  0xf5   :  { %v1521_v24 = vpack.c.bf16 %v1009_v18, %v1008_v15  ;;  %v1596_v25 = vpack.c.bf16 %v1039_v19, %v1038_v12  ;;  %v982_v26 = vadd.f32 %v2131_v42, %v917_v21  ;;  %v952_v27 = vadd.f32 %v2131_v42, %v887_v20 }
  0xf6   :  { %v487_v28 = vpop.f32.mrf.mxu0  ;;  %v607_v29 = vpop.f32.mrf.mxu1 }
  0xf7   :  { %1658 = vst [vmem:[%s2339_s4 + $0x8] sm:$0xff] %v1521_v24   ;;  %1673 = vst [vmem:[%s2339_s4 + $0x80] sm:$0xff] %v1596_v25   ;;  %v888_v30 = vmul.f32 %v2125_v38, %v487_v28  ;;  %v918_v31 = vmul.f32 %v2125_v38, %v607_v29  ;;  %v1040_v34 = vmax.f32 %v982_v26, 0.0  ;;  %v1010_v37 = vmax.f32 %v952_v27, 0.0 }
  0xf8   :  { %v1750_v32 = vpop.f32.mrf.mxu0  ;;  %v1810_v33 = vpop.f32.mrf.mxu1 }
  0xf9   :  { %v953_v35 = vadd.f32 %v2131_v42, %v888_v30  ;;  %v983_v36 = vadd.f32 %v2131_v42, %v918_v31 }
  0xfa   :  { %v492_v39 = vpop.f32.mrf.mxu0  ;;  %v612_v40 = vpop.f32.mrf.mxu1 }
  0xfb   :  { %v1011_v41 = vmax.f32 %v953_v35, 0.0  ;;  %v1041_v43 = vmax.f32 %v983_v36, 0.0  ;;  %v889_v44 = vmul.f32 %v2125_v38, %v492_v39  ;;  %v919_v45 = vmul.f32 %v2125_v38, %v612_v40 }
  0xfc   :  { %v1753_v46 = vpop.f32.mrf.mxu0  ;;  %v1813_v47 = vpop.f32.mrf.mxu1 }
  0xfd   :  { %v1526_v48 = vpack.c.bf16 %v1011_v41, %v1010_v37  ;;  %v1601_v49 = vpack.c.bf16 %v1041_v43, %v1040_v34  ;;  %v984_v50 = vadd.f32 %v2131_v42, %v919_v45  ;;  %v954_v51 = vadd.f32 %v2131_v42, %v889_v44 }
  0xfe   :  { %v495_v52 = vpop.f32.mrf.mxu0  ;;  %v615_v53 = vpop.f32.mrf.mxu1 }
  0xff   :  { %1659 = vst [vmem:[%s2339_s4 + $0x10] sm:$0xff] %v1526_v48   ;;  %1674 = vst [vmem:[%s2339_s4 + $0x88] sm:$0xff] %v1601_v49   ;;  %v890_v54 = vmul.f32 %v2125_v38, %v495_v52  ;;  %v920_v55 = vmul.f32 %v2125_v38, %v615_v53  ;;  %v1042_v58 = vmax.f32 %v984_v50, 0.0  ;;  %v1012_v61 = vmax.f32 %v954_v51, 0.0 }
 0x100   :  { %v1754_v56 = vpop.f32.mrf.mxu0  ;;  %v1814_v57 = vpop.f32.mrf.mxu1 }
 0x101   :  { %v955_v59 = vadd.f32 %v2131_v42, %v890_v54  ;;  %v985_v60 = vadd.f32 %v2131_v42, %v920_v55 }
 0x102   :  { %v500_v62 = vpop.f32.mrf.mxu0  ;;  %v620_v63 = vpop.f32.mrf.mxu1 }
 0x103   :  { %v1013_v0 = vmax.f32 %v955_v59, 0.0  ;;  %v1043_v1 = vmax.f32 %v985_v60, 0.0  ;;  %v891_v2 = vmul.f32 %v2125_v38, %v500_v62  ;;  %v921_v3 = vmul.f32 %v2125_v38, %v620_v63 }
 0x104   :  { %v1757_v4 = vpop.f32.mrf.mxu0  ;;  %v1817_v5 = vpop.f32.mrf.mxu1 }
 0x105   :  { %v1531_v6 = vpack.c.bf16 %v1013_v0, %v1012_v61  ;;  %v1606_v7 = vpack.c.bf16 %v1043_v1, %v1042_v58  ;;  %v986_v8 = vadd.f32 %v2131_v42, %v921_v3  ;;  %v956_v9 = vadd.f32 %v2131_v42, %v891_v2 }
 0x106   :  { %v503_v10 = vpop.f32.mrf.mxu0  ;;  %v623_v11 = vpop.f32.mrf.mxu1 }
 0x107   :  { %1660 = vst [vmem:[%s2339_s4 + $0x18] sm:$0xff] %v1531_v6   ;;  %1675 = vst [vmem:[%s2339_s4 + $0x90] sm:$0xff] %v1606_v7   ;;  %v892_v12 = vmul.f32 %v2125_v38, %v503_v10  ;;  %v922_v13 = vmul.f32 %v2125_v38, %v623_v11  ;;  %v1044_v16 = vmax.f32 %v986_v8, 0.0  ;;  %v1014_v19 = vmax.f32 %v956_v9, 0.0 }
 0x108   :  { %v1758_v14 = vpop.f32.mrf.mxu0  ;;  %v1818_v15 = vpop.f32.mrf.mxu1 }
 0x109   :  { %v957_v17 = vadd.f32 %v2131_v42, %v892_v12  ;;  %v987_v18 = vadd.f32 %v2131_v42, %v922_v13 }
 0x10a   :  { %v508_v20 = vpop.f32.mrf.mxu0  ;;  %v628_v21 = vpop.f32.mrf.mxu1 }
 0x10b   :  { %v1015_v22 = vmax.f32 %v957_v17, 0.0  ;;  %v1045_v23 = vmax.f32 %v987_v18, 0.0  ;;  %v893_v24 = vmul.f32 %v2125_v38, %v508_v20  ;;  %v923_v25 = vmul.f32 %v2125_v38, %v628_v21 }
 0x10c   :  { %v1761_v26 = vpop.f32.mrf.mxu0  ;;  %v1821_v27 = vpop.f32.mrf.mxu1 }
 0x10d   :  { %v1536_v28 = vpack.c.bf16 %v1015_v22, %v1014_v19  ;;  %v1611_v29 = vpack.c.bf16 %v1045_v23, %v1044_v16  ;;  %v988_v30 = vadd.f32 %v2131_v42, %v923_v25  ;;  %v958_v31 = vadd.f32 %v2131_v42, %v893_v24 }
 0x10e   :  { %v511_v32 = vpop.f32.mrf.mxu0  ;;  %v631_v33 = vpop.f32.mrf.mxu1 }
 0x10f   :  { %1661 = vst [vmem:[%s2339_s4 + $0x20] sm:$0xff] %v1536_v28   ;;  %1676 = vst [vmem:[%s2339_s4 + $0x98] sm:$0xff] %v1611_v29   ;;  %v894_v34 = vmul.f32 %v2125_v38, %v511_v32  ;;  %v924_v35 = vmul.f32 %v2125_v38, %v631_v33  ;;  %v1046_v39 = vmax.f32 %v988_v30, 0.0  ;;  %v1016_v43 = vmax.f32 %v958_v31, 0.0 }
 0x110   :  { %v1762_v36 = vpop.f32.mrf.mxu0  ;;  %v1822_v37 = vpop.f32.mrf.mxu1 }
 0x111   :  { %v959_v40 = vadd.f32 %v2131_v42, %v894_v34  ;;  %v989_v41 = vadd.f32 %v2131_v42, %v924_v35 }
 0x112   :  { %v516_v44 = vpop.f32.mrf.mxu0  ;;  %v636_v45 = vpop.f32.mrf.mxu1 }
 0x113   :  { %v1017_v46 = vmax.f32 %v959_v40, 0.0  ;;  %v1047_v47 = vmax.f32 %v989_v41, 0.0  ;;  %v895_v48 = vmul.f32 %v2125_v38, %v516_v44  ;;  %v925_v49 = vmul.f32 %v2125_v38, %v636_v45 }
 0x114   :  { %v1765_v50 = vpop.f32.mrf.mxu0  ;;  %v1825_v51 = vpop.f32.mrf.mxu1 }
 0x115   :  { %v1541_v52 = vpack.c.bf16 %v1017_v46, %v1016_v43  ;;  %v1616_v53 = vpack.c.bf16 %v1047_v47, %v1046_v39  ;;  %v990_v54 = vadd.f32 %v2131_v42, %v925_v49  ;;  %v960_v55 = vadd.f32 %v2131_v42, %v895_v48 }
 0x116   :  { %v519_v56 = vpop.f32.mrf.mxu0  ;;  %v639_v57 = vpop.f32.mrf.mxu1 }
 0x117   :  { %1662 = vst [vmem:[%s2339_s4 + $0x28] sm:$0xff] %v1541_v52   ;;  %1677 = vst [vmem:[%s2339_s4 + $0xa0] sm:$0xff] %v1616_v53   ;;  %v896_v58 = vmul.f32 %v2125_v38, %v519_v56  ;;  %v926_v59 = vmul.f32 %v2125_v38, %v639_v57  ;;  %v1048_v62 = vmax.f32 %v990_v54, 0.0  ;;  %v1018_v1 = vmax.f32 %v960_v55, 0.0 }
 0x118   :  { %v1766_v60 = vpop.f32.mrf.mxu0  ;;  %v1826_v61 = vpop.f32.mrf.mxu1 }
 0x119   :  { %v961_v63 = vadd.f32 %v2131_v42, %v896_v58  ;;  %v991_v0 = vadd.f32 %v2131_v42, %v926_v59 }
 0x11a   :  { %v524_v2 = vpop.f32.mrf.mxu0  ;;  %v644_v3 = vpop.f32.mrf.mxu1 }
 0x11b   :  { %v1019_v4 = vmax.f32 %v961_v63, 0.0  ;;  %v1049_v5 = vmax.f32 %v991_v0, 0.0  ;;  %v897_v6 = vmul.f32 %v2125_v38, %v524_v2  ;;  %v927_v7 = vmul.f32 %v2125_v38, %v644_v3 }
 0x11c   :  { %v1769_v8 = vpop.f32.mrf.mxu0  ;;  %v1829_v9 = vpop.f32.mrf.mxu1 }
 0x11d   :  { %v1546_v10 = vpack.c.bf16 %v1019_v4, %v1018_v1  ;;  %v1621_v11 = vpack.c.bf16 %v1049_v5, %v1048_v62  ;;  %v992_v12 = vadd.f32 %v2131_v42, %v927_v7  ;;  %v962_v13 = vadd.f32 %v2131_v42, %v897_v6 }
 0x11e   :  { %v527_v14 = vpop.f32.mrf.mxu0  ;;  %v647_v15 = vpop.f32.mrf.mxu1 }
 0x11f   :  { %1663 = vst [vmem:[%s2339_s4 + $0x30] sm:$0xff] %v1546_v10   ;;  %1678 = vst [vmem:[%s2339_s4 + $0xa8] sm:$0xff] %v1621_v11   ;;  %v898_v16 = vmul.f32 %v2125_v38, %v527_v14  ;;  %v928_v17 = vmul.f32 %v2125_v38, %v647_v15  ;;  %v1050_v20 = vmax.f32 %v992_v12, 0.0  ;;  %v1020_v23 = vmax.f32 %v962_v13, 0.0 }
 0x120   :  { %v1770_v18 = vpop.f32.mrf.mxu0  ;;  %v1830_v19 = vpop.f32.mrf.mxu1 }
 0x121   :  { %v963_v21 = vadd.f32 %v2131_v42, %v898_v16  ;;  %v993_v22 = vadd.f32 %v2131_v42, %v928_v17 }
 0x122   :  { %v532_v24 = vpop.f32.mrf.mxu0  ;;  %v652_v25 = vpop.f32.mrf.mxu1 }
 0x123   :  { %v1021_v26 = vmax.f32 %v963_v21, 0.0  ;;  %v1051_v27 = vmax.f32 %v993_v22, 0.0  ;;  %v899_v28 = vmul.f32 %v2125_v38, %v532_v24  ;;  %v929_v29 = vmul.f32 %v2125_v38, %v652_v25 }
 0x124   :  { %v1773_v30 = vpop.f32.mrf.mxu0  ;;  %v1833_v31 = vpop.f32.mrf.mxu1 }
 0x125   :  { %v1551_v32 = vpack.c.bf16 %v1021_v26, %v1020_v23  ;;  %v1626_v33 = vpack.c.bf16 %v1051_v27, %v1050_v20  ;;  %v994_v34 = vadd.f32 %v2131_v42, %v929_v29  ;;  %v964_v35 = vadd.f32 %v2131_v42, %v899_v28 }
 0x126   :  { %v535_v36 = vpop.f32.mrf.mxu0  ;;  %v655_v37 = vpop.f32.mrf.mxu1 }
 0x127   :  { %1664 = vst [vmem:[%s2339_s4 + $0x38] sm:$0xff] %v1551_v32   ;;  %1679 = vst [vmem:[%s2339_s4 + $0xb0] sm:$0xff] %v1626_v33   ;;  %v900_v39 = vmul.f32 %v2125_v38, %v535_v36  ;;  %v930_v40 = vmul.f32 %v2125_v38, %v655_v37  ;;  %v1052_v44 = vmax.f32 %v994_v34, 0.0  ;;  %v1022_v47 = vmax.f32 %v964_v35, 0.0 }
 0x128   :  { %v1774_v41 = vpop.f32.mrf.mxu0  ;;  %v1834_v43 = vpop.f32.mrf.mxu1 }
 0x129   :  { %v965_v45 = vadd.f32 %v2131_v42, %v900_v39  ;;  %v995_v46 = vadd.f32 %v2131_v42, %v930_v40 }
 0x12a   :  { %v540_v48 = vpop.f32.mrf.mxu0  ;;  %v660_v49 = vpop.f32.mrf.mxu1 }
 0x12b   :  { %v1023_v50 = vmax.f32 %v965_v45, 0.0  ;;  %v1053_v51 = vmax.f32 %v995_v46, 0.0  ;;  %v901_v52 = vmul.f32 %v2125_v38, %v540_v48  ;;  %v931_v53 = vmul.f32 %v2125_v38, %v660_v49 }
 0x12c   :  { %v1777_v54 = vpop.f32.mrf.mxu0  ;;  %v1837_v55 = vpop.f32.mrf.mxu1 }
 0x12d   :  { %v1556_v56 = vpack.c.bf16 %v1023_v50, %v1022_v47  ;;  %v1631_v57 = vpack.c.bf16 %v1053_v51, %v1052_v44  ;;  %v996_v58 = vadd.f32 %v2131_v42, %v931_v53  ;;  %v966_v59 = vadd.f32 %v2131_v42, %v901_v52 }
 0x12e   :  { %v543_v60 = vpop.f32.mrf.mxu0  ;;  %v663_v61 = vpop.f32.mrf.mxu1 }
 0x12f   :  { %1665 = vst [vmem:[%s2339_s4 + $0x40] sm:$0xff] %v1556_v56   ;;  %1680 = vst [vmem:[%s2339_s4 + $0xb8] sm:$0xff] %v1631_v57   ;;  %v902_v62 = vmul.f32 %v2125_v38, %v543_v60  ;;  %v932_v63 = vmul.f32 %v2125_v38, %v663_v61  ;;  %v1054_v2 = vmax.f32 %v996_v58, 0.0  ;;  %v1024_v5 = vmax.f32 %v966_v59, 0.0 }
 0x130   :  { %v1778_v0 = vpop.f32.mrf.mxu0  ;;  %v1838_v1 = vpop.f32.mrf.mxu1 }
 0x131   :  { %v967_v3 = vadd.f32 %v2131_v42, %v902_v62  ;;  %v997_v4 = vadd.f32 %v2131_v42, %v932_v63 }
 0x132   :  { %v548_v6 = vpop.f32.mrf.mxu0  ;;  %v668_v7 = vpop.f32.mrf.mxu1 }
 0x133   :  { %v1025_v8 = vmax.f32 %v967_v3, 0.0  ;;  %v1055_v9 = vmax.f32 %v997_v4, 0.0  ;;  %v903_v10 = vmul.f32 %v2125_v38, %v548_v6  ;;  %v933_v11 = vmul.f32 %v2125_v38, %v668_v7 }
 0x134   :  { %v1781_v12 = vpop.f32.mrf.mxu0  ;;  %v1841_v13 = vpop.f32.mrf.mxu1 }
 0x135   :  { %v1561_v14 = vpack.c.bf16 %v1025_v8, %v1024_v5  ;;  %v1636_v15 = vpack.c.bf16 %v1055_v9, %v1054_v2  ;;  %v998_v16 = vadd.f32 %v2131_v42, %v933_v11  ;;  %v968_v17 = vadd.f32 %v2131_v42, %v903_v10 }
 0x136   :  { %v551_v18 = vpop.f32.mrf.mxu0  ;;  %v671_v19 = vpop.f32.mrf.mxu1 }
 0x137   :  { %1666 = vst [vmem:[%s2339_s4 + $0x48] sm:$0xff] %v1561_v14   ;;  %1681 = vst [vmem:[%s2339_s4 + $0xc0] sm:$0xff] %v1636_v15   ;;  %v904_v20 = vmul.f32 %v2125_v38, %v551_v18  ;;  %v934_v21 = vmul.f32 %v2125_v38, %v671_v19  ;;  %v1056_v24 = vmax.f32 %v998_v16, 0.0  ;;  %v1026_v27 = vmax.f32 %v968_v17, 0.0 }
 0x138   :  { %v1782_v22 = vpop.f32.mrf.mxu0  ;;  %v1842_v23 = vpop.f32.mrf.mxu1 }
 0x139   :  { %v969_v25 = vadd.f32 %v2131_v42, %v904_v20  ;;  %v999_v26 = vadd.f32 %v2131_v42, %v934_v21 }
 0x13a   :  { %v556_v28 = vpop.f32.mrf.mxu0  ;;  %v676_v29 = vpop.f32.mrf.mxu1 }
 0x13b   :  { %v1027_v30 = vmax.f32 %v969_v25, 0.0  ;;  %v1057_v31 = vmax.f32 %v999_v26, 0.0  ;;  %v905_v32 = vmul.f32 %v2125_v38, %v556_v28  ;;  %v935_v33 = vmul.f32 %v2125_v38, %v676_v29 }
 0x13c   :  { %v1785_v34 = vpop.f32.mrf.mxu0  ;;  %v1845_v35 = vpop.f32.mrf.mxu1 }
 0x13d   :  { %v1566_v36 = vpack.c.bf16 %v1027_v30, %v1026_v27  ;;  %v1641_v37 = vpack.c.bf16 %v1057_v31, %v1056_v24  ;;  %v1000_v39 = vadd.f32 %v2131_v42, %v935_v33  ;;  %v970_v40 = vadd.f32 %v2131_v42, %v905_v32 }
 0x13e   :  { %v559_v41 = vpop.f32.mrf.mxu0  ;;  %v679_v43 = vpop.f32.mrf.mxu1 }
 0x13f   :  { %1667 = vst [vmem:[%s2339_s4 + $0x50] sm:$0xff] %v1566_v36   ;;  %1682 = vst [vmem:[%s2339_s4 + $0xc8] sm:$0xff] %v1641_v37   ;;  %v906_v44 = vmul.f32 %v2125_v38, %v559_v41  ;;  %v936_v45 = vmul.f32 %v2125_v38, %v679_v43  ;;  %v1058_v48 = vmax.f32 %v1000_v39, 0.0  ;;  %v1028_v51 = vmax.f32 %v970_v40, 0.0 }
 0x140   :  { %v1786_v46 = vpop.f32.mrf.mxu0  ;;  %v1846_v47 = vpop.f32.mrf.mxu1 }
 0x141   :  { %v971_v49 = vadd.f32 %v2131_v42, %v906_v44  ;;  %v1001_v50 = vadd.f32 %v2131_v42, %v936_v45 }
 0x142   :  { %v564_v52 = vpop.f32.mrf.mxu0  ;;  %v684_v53 = vpop.f32.mrf.mxu1 }
 0x143   :  { %v1029_v54 = vmax.f32 %v971_v49, 0.0  ;;  %v1059_v55 = vmax.f32 %v1001_v50, 0.0  ;;  %v907_v56 = vmul.f32 %v2125_v38, %v564_v52  ;;  %v937_v57 = vmul.f32 %v2125_v38, %v684_v53 }
 0x144   :  { %v1789_v58 = vpop.f32.mrf.mxu0  ;;  %v1849_v59 = vpop.f32.mrf.mxu1 }
 0x145   :  { %v1571_v60 = vpack.c.bf16 %v1029_v54, %v1028_v51  ;;  %v1646_v61 = vpack.c.bf16 %v1059_v55, %v1058_v48  ;;  %v1002_v62 = vadd.f32 %v2131_v42, %v937_v57  ;;  %v972_v63 = vadd.f32 %v2131_v42, %v907_v56 }
 0x146   :  { %v567_v0 = vpop.f32.mrf.mxu0  ;;  %v687_v1 = vpop.f32.mrf.mxu1 }
 0x147   :  { %1668 = vst [vmem:[%s2339_s4 + $0x58] sm:$0xff] %v1571_v60   ;;  %1683 = vst [vmem:[%s2339_s4 + $0xd0] sm:$0xff] %v1646_v61   ;;  %v908_v2 = vmul.f32 %v2125_v38, %v567_v0  ;;  %v938_v3 = vmul.f32 %v2125_v38, %v687_v1  ;;  %v1060_v6 = vmax.f32 %v1002_v62, 0.0  ;;  %v1030_v9 = vmax.f32 %v972_v63, 0.0 }
 0x148   :  { %v1790_v4 = vpop.f32.mrf.mxu0  ;;  %v1850_v5 = vpop.f32.mrf.mxu1 }
 0x149   :  { %v973_v7 = vadd.f32 %v2131_v42, %v908_v2  ;;  %v1003_v8 = vadd.f32 %v2131_v42, %v938_v3 }
 0x14a   :  { %v572_v10 = vpop.f32.mrf.mxu0  ;;  %v692_v11 = vpop.f32.mrf.mxu1 }
 0x14b   :  { %v1031_v12 = vmax.f32 %v973_v7, 0.0  ;;  %v1061_v13 = vmax.f32 %v1003_v8, 0.0  ;;  %v909_v14 = vmul.f32 %v2125_v38, %v572_v10  ;;  %v939_v15 = vmul.f32 %v2125_v38, %v692_v11 }
 0x14c   :  { %v1793_v16 = vpop.f32.mrf.mxu0  ;;  %v1853_v17 = vpop.f32.mrf.mxu1 }
 0x14d   :  { %v1576_v18 = vpack.c.bf16 %v1031_v12, %v1030_v9  ;;  %v1651_v19 = vpack.c.bf16 %v1061_v13, %v1060_v6  ;;  %v1004_v20 = vadd.f32 %v2131_v42, %v939_v15  ;;  %v974_v23 = vadd.f32 %v2131_v42, %v909_v14 }
 0x14e   :  { %v575_v21 = vpop.f32.mrf.mxu0  ;;  %v695_v22 = vpop.f32.mrf.mxu1 }
 0x14f   :  { %1669 = vst [vmem:[%s2339_s4 + $0x60] sm:$0xff] %v1576_v18   ;;  %1684 = vst [vmem:[%s2339_s4 + $0xd8] sm:$0xff] %v1651_v19   ;;  %v910_v24 = vmul.f32 %v2125_v38, %v575_v21  ;;  %v940_v25 = vmul.f32 %v2125_v38, %v695_v22  ;;  %v1062_v28 = vmax.f32 %v1004_v20, 0.0  ;;  %v1032_v32 = vmax.f32 %v974_v23, 0.0 }
 0x150   :  { %v1794_v26 = vpop.f32.mrf.mxu0  ;;  %v1854_v27 = vpop.f32.mrf.mxu1 }
 0x151   :  { %v975_v29 = vadd.f32 %v2131_v42, %v910_v24  ;;  %v1005_v30 = vadd.f32 %v2131_v42, %v940_v25 }
 0x152   :  { %v580_v31 = vpop.f32.mrf.mxu0 }
 0x153   :  { %v1033_v33 = vmax.f32 %v975_v29, 0.0  ;;  %v1063_v34 = vmax.f32 %v1005_v30, 0.0  ;;  %v911_v35 = vmul.f32 %v2125_v38, %v580_v31 }
 0x154   :  { %v1797_v36 = vpop.f32.mrf.mxu0 }
 0x155   :  { %v1581_v37 = vpack.c.bf16 %v1033_v33, %v1032_v32  ;;  %v1656_v39 = vpack.c.bf16 %v1063_v34, %v1062_v28  ;;  %v976_v41 = vadd.f32 %v2131_v42, %v911_v35 }
 0x156   :  { %v583_v40 = vpop.f32.mrf.mxu0 }
 0x157   :  { %1670 = vst [vmem:[%s2339_s4 + $0x68] sm:$0xff] %v1581_v37   ;;  %1685 = vst [vmem:[%s2339_s4 + $0xe0] sm:$0xff] %v1656_v39   ;;  %v912_v43 = vmul.f32 %v2125_v38, %v583_v40  ;;  %v1034_v46 = vmax.f32 %v976_v41, 0.0 }
 0x158   :  { %v1798_v44 = vpop.f32.mrf.mxu0 }
 0x159   :  { %v977_v45 = vadd.f32 %v2131_v42, %v912_v43 }
 0x15b   :  { %v1035_v47 = vmax.f32 %v977_v45, 0.0 }
 0x15d   :  { %v1586_v48 = vpack.c.bf16 %v1035_v47, %v1034_v46 }
 0x15f   :  { %1671 = vst [vmem:[%s2339_s4 + $0x70] sm:$0xff] %v1586_v48  }

// kernel: inception_forward.12
= control target key start
LH: loop header
LB: loop body
LE: loop exit
PB: predicated region body
PF: predicated region fallthrough
CT: control target
= control target key end

     0   :  { %s667_s15 = smov 0   ;;  %s845_s0 = inlined_call_operand.vmem [shape: bf16[2,8,8,16], index: 0, kind: input, shape index: {}]   ;;  %s846_s1 = inlined_call_operand.vmem [shape: bf16[2,8,7,16], index: 1, kind: input, shape index: {}]   ;;  %s847_s2 = inlined_call_operand.vmem [shape: bf16[2,7,8,16], index: 2, kind: input, shape index: {}]   ;;  %s848_s3 = inlined_call_operand.vmem [shape: bf16[2,7,7,16], index: 3, kind: input, shape index: {}]   ;;  %s849_s4 = inlined_call_operand.vmem [shape: bf16[2,7,7,16], index: 4, kind: output, shape index: {}]  }
   0x1 LB: > { %s609_s16 = sadd.s32 4294967295, %s640_s15   ;;  %p613_p0 = scmp.ge.s32.totalorder %s640_s15, 1  ;;  %s640_s15 = sphi %s667_s15, %s14_s15  }
   0x2   : > { %p192_p1 = scmp.lt.s32.totalorder %s640_s15, 3 }
   0x4   : > { %p193_p2 = pnand %p613_p0, %p192_p1 }
   0x5   : > { %p233_p3 = scmp.lt.s32.totalorder (!%p193_p2), %s609_s16, 1 }
   0x6   : > { %196 = sbr.rel (%p193_p2) target bundleno = 66 (0x42), region = 36 }
   0xb   : > { %s853_s16 = smov (!%p233_p3, %s609_s16), 1  ;;  %vm494_vm0 = vcmask 125952   ;;  %vm495_vm1 = vsmask.f32 3328 }
   0xc   : > { %s623_s17 = sshll.u32 %s853_s16, 5  ;;  %s675_s18 = smul.u32 28, %s853_s16  ;;  %vm787_vm2 = vmand %vm494_vm0, %vm495_vm1 }
   0xd   : > { %s680_s21 = scalar_lea.vmem %s845_s0, %s623_s17  ;;  %s685_s24 = scalar_lea.vmem %s846_s1, %s623_s17 }
   0xe   : > { %s691_s27 = scalar_lea.vmem %s847_s2, %s675_s18  ;;  %v258_v0 = vld [vmem:[%s680_s21] sm:$0xf]  ;;  %v695_v1 = vld [vmem:[%s680_s21 + $0x4] sm:$0xf]  ;;  %v716_v19 = vld [vmem:[%s680_s21 + $0x8] sm:$0xf]  ;;  %s726_s30 = scalar_lea.vmem %s848_s3, %s675_s18 }
   0xf   : > { %v266_v2 = vld [vmem:[%s685_s24] sm:$0xf]  ;;  %v699_v3 = vld [vmem:[%s685_s24 + $0x4] sm:$0xf]  ;;  %v296_v8 = vshrl.u32 %v258_v0, 16  ;;  %v299_v9 = vshll.u32 %v258_v0, 16  ;;  %s774_s7 = scalar_lea.vmem %s849_s4, %s675_s18 }
  0x10   : > { %v702_v4 = vld [vmem:[%s691_s27] sm:$0xf]  ;;  %v705_v5 = vld [vmem:[%s691_s27 + $0x4] sm:$0xf]  ;;  %v288_v6 = vmax.bf16 %v266_v2, %v258_v0  ;;  %v289_v7 = vmax.bf16 %v699_v3, %v695_v1  ;;  %v305_v10 = vshrl.u32 %v695_v1, 16  ;;  %v308_v11 = vshll.u32 %v695_v1, 16 }
  0x11   : > { %v387_v12 = vshrl.u32 %v702_v4, 16  ;;  %v390_v13 = vshll.u32 %v702_v4, 16  ;;  %v396_v14 = vshrl.u32 %v705_v5, 16  ;;  %v298_v15 = vrot.slane %v296_v8, 4  ;;  %v719_v23 = vld [vmem:[%s685_s24 + $0x8] sm:$0xf] }
  0x12   : > { %v301_v16 = vrot.slane %v299_v9, 5  ;;  %v307_v17 = vrot.slane %v305_v10, 4  ;;  %v399_v18 = vshll.u32 %v705_v5, 16  ;;  %v310_v20 = vrot.slane %v308_v11, 5  ;;  %v729_v26 = vld [vmem:[%s691_s27 + $0x8] sm:$0xf] }
  0x13   : > { %v389_v21 = vrot.slane %v387_v12, 4  ;;  %v392_v22 = vrot.slane %v390_v13, 5  ;;  %v314_v24 = vshrl.u32 %v716_v19, 16  ;;  %v290_v27 = vmax.bf16 %v719_v23, %v716_v19  ;;  %v735_v34 = vld [vmem:[%s680_s21 + $0xc] sm:$0xf] }
  0x14   : > { %v302_v25 = vor.u32 %v301_v16, %v298_v15  ;;  %v317_v28 = vshll.u32 %v716_v19, 16  ;;  %v398_v29 = vrot.slane %v396_v14, 4  ;;  %v311_v30 = vor.u32 %v310_v20, %v307_v17  ;;  %v740_v39 = vld [vmem:[%s685_s24 + $0xc] sm:$0xf]  ;;  %v281_v40 = vld [vmem:[%s726_s30] sm:$0xf] }
  0x15   : > { %v393_v31 = vor.u32 %v392_v22, %v389_v21  ;;  %v316_v32 = vrot.slane %v314_v24, 4  ;;  %v401_v33 = vrot.slane %v399_v18, 5  ;;  %v405_v37 = vshrl.u32 %v729_v26, 16  ;;  %v282_v46 = vld [vmem:[%s726_s30 + $0x4] sm:$0xf] }
  0x16   : > { %v303_v35 = vrot.slane %v302_v25, 4  ;;  %v319_v36 = vrot.slane %v317_v28, 5  ;;  %v408_v38 = vshll.u32 %v729_v26, 16  ;;  %v743_v41 = vrot.slane %v311_v30, 4  ;;  %v277_v48 = vld [vmem:[%s691_s27 + $0xc] sm:$0xf] }
  0x17   : > { %v394_v42 = vrot.slane %v393_v31, 4  ;;  %v402_v43 = vor.u32 %v401_v33, %v398_v29  ;;  %v291_v44 = vmax.bf16 %v740_v39, %v735_v34  ;;  %v323_v49 = vshrl.u32 %v735_v34, 16  ;;  %v753_v55 = vld [vmem:[%s685_s24 + $0x10] sm:$0xf]  ;;  %v768_v22 = vld [vmem:[%s685_s24 + $0x14] sm:$0xf] }
  0x18   : > { %v365_v45 = vmax.bf16 %v303_v35, %v288_v6  ;;  %v320_v47 = vor.u32 %v319_v36, %v316_v32  ;;  %v326_v50 = vshll.u32 %v735_v34, 16  ;;  %v366_v51 = vmax.bf16 %v743_v41, %v289_v7  ;;  %v757_v60 = vld [vmem:[%s680_s21 + $0x10] sm:$0xf]  ;;  %v283_v7 = vld [vmem:[%s726_s30 + $0x8] sm:$0xf] }
  0x19   : > { %v403_v52 = vrot.slane %v402_v43, 4  ;;  %v407_v53 = vrot.slane %v405_v37, 4  ;;  %v410_v54 = vrot.slane %v408_v38, 5  ;;  %v325_v58 = vrot.slane %v323_v49, 4  ;;  %v278_v11 = vld [vmem:[%s691_s27 + $0x10] sm:$0xf] }
  0x1a   : > { %v372_v56 = vmax.bf16 %v365_v45, %v702_v4  ;;  %v321_v57 = vrot.slane %v320_v47, 4  ;;  %v328_v59 = vrot.slane %v326_v50, 5  ;;  %v373_v61 = vmax.bf16 %v366_v51, %v705_v5  ;;  %v284_v30 = vld [vmem:[%s726_s30 + $0xc] sm:$0xf]  ;;  %v500_v45 = vld [vmem:[%s774_s7 + $0x4] sm:$0xf] }
  0x1b   : > { %v411_v62 = vor.u32 %v410_v54, %v407_v53  ;;  %v414_v63 = vshrl.u32 %v277_v48, 16  ;;  %v417_v0 = vshll.u32 %v277_v48, 16  ;;  %v292_v4 = vmax.bf16 %v753_v55, %v757_v60 }
  0x1c   : > { %v379_v2 = vmax.bf16 %v372_v56, %v281_v40  ;;  %v367_v6 = vmax.bf16 %v321_v57, %v290_v27  ;;  %v329_v8 = vor.u32 %v328_v59, %v325_v58  ;;  %v380_v9 = vmax.bf16 %v373_v61, %v282_v46  ;;  %v805_v59 = vld [vmem:[%s685_s24 + $0x18] sm:$0xf]  ;;  %v503_v61 = vld [vmem:[%s774_s7 + $0x8] sm:$0xf] }
  0x1d   : > { %v412_v10 = vrot.slane %v411_v62, 4  ;;  %v332_v12 = vshrl.u32 %v757_v60, 16  ;;  %v335_v5 = vshll.u32 %v757_v60, 16  ;;  %v416_v16 = vrot.slane %v414_v63, 4 }
  0x1e   : > { %v456_v13 = vmax.bf16 %v394_v42, %v379_v2  ;;  %v374_v14 = vmax.bf16 %v367_v6, %v729_v26  ;;  %v330_v15 = vrot.slane %v329_v8, 4  ;;  %v457_v17 = vmax.bf16 %v403_v52, %v380_v9  ;;  %v778_v26 = vld [vmem:[%s680_s21 + $0x14] sm:$0xf]  ;;  %v280_v9 = vld [vmem:[%s691_s27 + $0x18] sm:$0xf] }
  0x1f   : > { %v334_v18 = vrot.slane %v332_v12, 4  ;;  %v337_v20 = vrot.slane %v335_v5, 5  ;;  %v419_v21 = vrot.slane %v417_v0, 5  ;;  %v423_v28 = vshrl.u32 %v278_v11, 16 }
  0x20   : > { %v463_v24 = vmax.bf16 %v456_v13, %v695_v1  ;;  %v368_v25 = vmax.bf16 %v330_v15, %v291_v44  ;;  %v381_v27 = vmax.bf16 %v374_v14, %v283_v7  ;;  %v464_v29 = vmax.bf16 %v457_v17, %v716_v19  ;;  %v497_v19 = vld [vmem:[%s774_s7] sm:$0xf] }
  0x21   : > { %v338_v31 = vor.u32 %v337_v20, %v334_v18  ;;  %v420_v32 = vor.u32 %v419_v21, %v416_v16  ;;  %v426_v33 = vshll.u32 %v278_v11, 16  ;;  %v293_v1 = vmax.bf16 %v768_v22, %v778_v26  ;;  %v265_v16 = vld [vmem:[%s680_s21 + $0x1c] sm:$0xf] }
  0x22   : > { %v470_v35 = vmax.bf16 %v463_v24, %v699_v3  ;;  %v375_v36 = vmax.bf16 %v368_v25, %v277_v48  ;;  %v458_v37 = vmax.bf16 %v412_v10, %v381_v27  ;;  %v471_v40 = vmax.bf16 %v464_v29, %v719_v23  ;;  %v279_v48 = vld [vmem:[%s691_s27 + $0x14] sm:$0xf]  ;;  %v285_v23 = vld [vmem:[%s726_s30 + $0x10] sm:$0xf] }
  0x23   : > { %v339_v42 = vrot.slane %v338_v31, 4  ;;  %v421_v43 = vrot.slane %v420_v32, 4  ;;  %v341_v44 = vshrl.u32 %v778_v26, 16  ;;  %v344_v49 = vshll.u32 %v778_v26, 16  ;;  %v286_v29 = vld [vmem:[%s726_s30 + $0x14] sm:$0xf] }
  0x24   : > { %v487_v3 = vmax.bf16 %v470_v35, %v743_v41  ;;  %v465_v46 = vmax.bf16 %v458_v37, %v735_v34  ;;  %v382_v47 = vmax.bf16 %v375_v36, %v284_v30  ;;  %v488_v50 = vmax.bf16 %v471_v40, %v321_v57  ;;  %v264_v34 = vld [vmem:[%s680_s21 + $0x18] sm:$0xf] }
  0x25   : > { %v369_v51 = vmax.bf16 %v339_v42, %v292_v4  ;;  %v343_v52 = vrot.slane %v341_v44, 4  ;;  %v425_v53 = vrot.slane %v423_v28, 4  ;;  %v346_v58 = vrot.slane %v344_v49, 5 }
  0x26   : > { %v498_v54 = vsel %vm787_vm2, %v487_v3, %v497_v19  ;;  %v472_v41 = vmax.bf16 %v465_v46, %v740_v39  ;;  %v459_v56 = vmax.bf16 %v421_v43, %v382_v47  ;;  %v501_v57 = vsel %vm787_vm2, %v488_v50, %v500_v45  ;;  %v509_v45 = vld [vmem:[%s774_s7 + $0x10] sm:$0xf] }
  0x27   : > { %499 = vst [vmem:[%s774_s7] sm:$0xf] %v498_v54  ;;  %v376_v62 = vmax.bf16 %v369_v51, %v278_v11  ;;  %v428_v63 = vrot.slane %v426_v33, 5  ;;  %v432_v0 = vshrl.u32 %v279_v48, 16  ;;  %502 = vst [vmem:[%s774_s7 + $0x4] sm:$0xf] %v501_v57  ;;  %v347_v6 = vor.u32 %v346_v58, %v343_v52 }
  0x28   : > { %v489_v2 = vmax.bf16 %v472_v41, %v330_v15  ;;  %v466_v39 = vmax.bf16 %v459_v56, %v757_v60  ;;  %v435_v7 = vshll.u32 %v279_v48, 16  ;;  %v294_v10 = vmax.bf16 %v805_v59, %v264_v34  ;;  %v506_v15 = vld [vmem:[%s774_s7 + $0xc] sm:$0xf]  ;;  %v287_v51 = vld [vmem:[%s726_s30 + $0x18] sm:$0xf] }
  0x29   : > { %v383_v8 = vmax.bf16 %v376_v62, %v285_v23  ;;  %v429_v4 = vor.u32 %v428_v63, %v425_v53  ;;  %v350_v12 = vshrl.u32 %v264_v34, 16  ;;  %v348_v13 = vrot.slane %v347_v6, 4  ;;  %v512_v56 = vld [vmem:[%s774_s7 + $0x14] sm:$0xf] }
  0x2a   : > { %v504_v11 = vsel %vm787_vm2, %v489_v2, %v503_v61  ;;  %v473_v5 = vmax.bf16 %v466_v39, %v753_v55  ;;  %v353_v14 = vshll.u32 %v264_v34, 16  ;;  %v434_v18 = vrot.slane %v432_v0, 4  ;;  %v273_v61 = vld [vmem:[%s685_s24 + $0x1c] sm:$0xf]  ;;  %v515_v2 = vld [vmem:[%s774_s7 + $0x18] sm:$0xf] }
  0x2b   : > { %505 = vst [vmem:[%s774_s7 + $0x8] sm:$0xf] %v504_v11  ;;  %v430_v60 = vrot.slane %v429_v4, 4  ;;  %v352_v17 = vrot.slane %v350_v12, 4  ;;  %v437_v20 = vrot.slane %v435_v7, 5  ;;  %v370_v24 = vmax.bf16 %v348_v13, %v293_v1 }
  0x2c   : > { %v490_v21 = vmax.bf16 %v473_v5, %v339_v42  ;;  %v355_v25 = vrot.slane %v353_v14, 5  ;;  %v441_v27 = vshrl.u32 %v280_v9, 16  ;;  %v444_v31 = vshll.u32 %v280_v9, 16 }
  0x2d   : > { %v460_v28 = vmax.bf16 %v430_v60, %v383_v8  ;;  %v438_v30 = vor.u32 %v437_v20, %v434_v18  ;;  %v478_v55 = vshrl.u32 %v265_v16, 16  ;;  %v377_v33 = vmax.bf16 %v370_v24, %v279_v48 }
  0x2e   : > { %v507_v32 = vsel %vm787_vm2, %v490_v21, %v506_v15  ;;  %v356_v35 = vor.u32 %v355_v25, %v352_v17  ;;  %v443_v36 = vrot.slane %v441_v27, 4  ;;  %v446_v1 = vrot.slane %v444_v31, 5 }
  0x2f   : > { %508 = vst [vmem:[%s774_s7 + $0xc] sm:$0xf] %v507_v32  ;;  %v467_v37 = vmax.bf16 %v460_v28, %v778_v26  ;;  %v439_v19 = vrot.slane %v438_v30, 4  ;;  %v384_v42 = vmax.bf16 %v377_v33, %v286_v29  ;;  %v481_v43 = vshll.u32 %v265_v16, 16 }
  0x30   : > { %v357_v40 = vrot.slane %v356_v35, 4  ;;  %v447_v3 = vor.u32 %v446_v1, %v443_v36  ;;  %v480_v48 = vrot.slane %v478_v55, 4 }
  0x31   : > { %v474_v44 = vmax.bf16 %v467_v37, %v768_v22  ;;  %v461_v47 = vmax.bf16 %v439_v19, %v384_v42  ;;  %v483_v49 = vrot.slane %v481_v43, 5 }
  0x32   : > { %v371_v46 = vmax.bf16 %v357_v40, %v294_v10  ;;  %v448_v52 = vrot.slane %v447_v3, 4 }
  0x33   : > { %v491_v50 = vmax.bf16 %v474_v44, %v348_v13  ;;  %v468_v23 = vmax.bf16 %v461_v47, %v264_v34  ;;  %v484_v41 = vor.u32 %v483_v49, %v480_v48 }
  0x34   : > { %v378_v26 = vmax.bf16 %v371_v46, %v280_v9 }
  0x35   : > { %v510_v53 = vsel %vm787_vm2, %v491_v50, %v509_v45  ;;  %v475_v22 = vmax.bf16 %v468_v23, %v805_v59  ;;  %v485_v34 = vrot.slane %v484_v41, 4 }
  0x36   : > { %511 = vst [vmem:[%s774_s7 + $0x10] sm:$0xf] %v510_v53  ;;  %v385_v54 = vmax.bf16 %v378_v26, %v287_v51 }
  0x37   : > { %v492_v58 = vmax.bf16 %v475_v22, %v357_v40 }
  0x38   : > { %v462_v57 = vmax.bf16 %v448_v52, %v385_v54 }
  0x39   : > { %v513_v62 = vsel %vm787_vm2, %v492_v58, %v512_v56 }
  0x3a   : > { %v469_v63 = vmax.bf16 %v462_v57, %v265_v16  ;;  %514 = vst [vmem:[%s774_s7 + $0x14] sm:$0xf] %v513_v62 }
  0x3c   : > { %v476_v0 = vmax.bf16 %v469_v63, %v273_v61 }
  0x3e   : > { %v493_v39 = vmax.bf16 %v485_v34, %v476_v0 }
  0x40   : > { %v516_v6 = vsel %vm787_vm2, %v493_v39, %v515_v2 }
  0x41   : > { %517 = vst [vmem:[%s774_s7 + $0x18] sm:$0xf] %v516_v6 }
  0x42 PF: > { %s14_s15 = sadd.s32 1, %s640_s15  }
  0x43   : > { %p11_p4 = scmp.ge.s32.totalorder %s14_s15, 4  }
  0x45   :  { %13 = sbr.rel (!%p11_p4) target bundleno = 1 (0x1), region = 75 }

// kernel: inception_forward.13
= control target key start
LH: loop header
LB: loop body
LE: loop exit
PB: predicated region body
PF: predicated region fallthrough
CT: control target
= control target key end

     0   :  { %v612_v0 = vmov 0.0   ;;  %vm613_vm0 = vmmov 0   ;;  %s750_s1 = inlined_call_operand.vmem [shape: bf16[128,128], index: 1, kind: input, shape index: {}]   ;;  %s751_s0 = inlined_call_operand.vmem [shape: bf16[112,128], index: 0, kind: input, shape index: {}]   ;;  %s752_s2 = inlined_call_operand.vmem [shape: f32[1,128], index: 2, kind: input, shape index: {}]   ;;  %s753_s3 = inlined_call_operand.vmem [shape: f32[1,128], index: 3, kind: input, shape index: {}]   ;;  %s754_s4 = inlined_call_operand.vmem [shape: bf16[112,128], index: 4, kind: output, shape index: {}]  }
   0x1   :  { %535 = vmatprep.subr.bf16.mxu0 %v612_v0  ;;  %v597_v1 = vld [vmem:[%s750_s1 + $0x38] sm:$0xff]   ;;  %579 = vmatprep.subr.bf16.mxu1 %v612_v0  ;;  %v598_v2 = vld [vmem:[%s750_s1 + $0x30] sm:$0xff]   ;;  %v599_v3 = vld [vmem:[%s750_s1 + $0x28] sm:$0xff]  }
   0x2   :  { %551 = vmatprep.mubr.msk.bf16.mxu0 %vm613_vm0, %v612_v0  ;;  %567 = vmatprep.mubr.msk.bf16.mxu1 %vm613_vm0, %v612_v0  ;;  %v600_v4 = vld [vmem:[%s750_s1 + $0x20] sm:$0xff]   ;;  %v601_v5 = vld [vmem:[%s750_s1 + $0x18] sm:$0xff]   ;;  %v602_v6 = vld [vmem:[%s750_s1 + $0x10] sm:$0xff]  }
   0x3   :  { %536 = vmatpush3.bf16.msra.mxu0 %v597_v1  ;;  %587 = vmatpush3.bf16.msra.mxu1 %v597_v1  ;;  %v603_v7 = vld [vmem:[%s750_s1 + $0x8] sm:$0xff]   ;;  %v604_v8 = vld [vmem:[%s750_s1] sm:$0xff]   ;;  %v609_v13 = vld [vmem:[%s751_s0 + $0x10] sm:$0xff]  }
   0x4   :  { %537 = vmatprep.subr.bf16.mxu0 %v612_v0  ;;  %580 = vmatprep.subr.bf16.mxu1 %v612_v0  ;;  %v605_v9 = vld [vmem:[%s751_s0] sm:$0xff]   ;;  %v607_v11 = vld [vmem:[%s751_s0 + $0x8] sm:$0xff]   ;;  %v610_v14 = vld [vmem:[%s751_s0 + $0x30] sm:$0xff]  }
   0x5   :  { %v606_v10 = vld [vmem:[%s751_s0 + $0x20] sm:$0xff]   ;;  %v608_v12 = vld [vmem:[%s751_s0 + $0x28] sm:$0xff]   ;;  %v611_v15 = vld [vmem:[%s751_s0 + $0x18] sm:$0xff]  }
   0x6   :  { %v694_v16 = vld [vmem:[%s752_s2] ss:$0 sm:$0xff] }
   0x7   :  { %538 = vmatpush3.bf16.msra.mxu0 %v598_v2  ;;  %588 = vmatpush3.bf16.msra.mxu1 %v598_v2  ;;  %v700_v20 = vld [vmem:[%s753_s3] ss:$0 sm:$0xff] }
   0x8   :  { %539 = vmatprep.subr.bf16.mxu0 %v612_v0  ;;  %581 = vmatprep.subr.bf16.mxu1 %v612_v0 }
   0xb   :  { %540 = vmatpush3.bf16.msra.mxu0 %v599_v3  ;;  %589 = vmatpush3.bf16.msra.mxu1 %v599_v3 }
   0xc   :  { %541 = vmatprep.subr.bf16.mxu0 %v612_v0  ;;  %582 = vmatprep.subr.bf16.mxu1 %v612_v0 }
   0xf   :  { %542 = vmatpush3.bf16.msra.mxu0 %v600_v4  ;;  %590 = vmatpush3.bf16.msra.mxu1 %v600_v4 }
  0x10   :  { %543 = vmatprep.subr.bf16.mxu0 %v612_v0  ;;  %583 = vmatprep.subr.bf16.mxu1 %v612_v0 }
  0x13   :  { %544 = vmatpush3.bf16.msra.mxu0 %v601_v5  ;;  %591 = vmatpush3.bf16.msra.mxu1 %v601_v5 }
  0x14   :  { %545 = vmatprep.subr.bf16.mxu0 %v612_v0  ;;  %584 = vmatprep.subr.bf16.mxu1 %v612_v0 }
  0x17   :  { %546 = vmatpush3.bf16.msra.mxu0 %v602_v6  ;;  %592 = vmatpush3.bf16.msra.mxu1 %v602_v6 }
  0x18   :  { %547 = vmatprep.subr.bf16.mxu0 %v612_v0  ;;  %585 = vmatprep.subr.bf16.mxu1 %v612_v0 }
  0x1b   :  { %548 = vmatpush3.bf16.msra.mxu0 %v603_v7  ;;  %593 = vmatpush3.bf16.msra.mxu1 %v603_v7 }
  0x1c   :  { %549 = vmatprep.subr.bf16.mxu0 %v612_v0  ;;  %586 = vmatprep.subr.bf16.mxu1 %v612_v0 }
  0x1f   :  { %550 = vmatpush3.bf16.msra.mxu0 %v604_v8  ;;  %594 = vmatpush3.bf16.msra.mxu1 %v604_v8 }
  0x22   :  { %552 = vmatmul.mubr.bf16.vlgmr.msra.gmra.mxu0 %v605_v9  ;;  %568 = vmatmul.mubr.bf16.vlgmr.msra.gmra.mxu1 %v606_v10 }
  0x23   :  { %555 = vmatprep.mubr.msk.bf16.mxu0 %vm613_vm0, %v612_v0  ;;  %571 = vmatprep.mubr.msk.bf16.mxu1 %vm613_vm0, %v612_v0 }
  0x2a   :  { %556 = vmatmul.mubr.bf16.gmra.mxu0 %v607_v11  ;;  %572 = vmatmul.mubr.bf16.gmra.mxu1 %v608_v12 }
  0x2b   :  { %559 = vmatprep.mubr.msk.bf16.mxu0 %vm613_vm0, %v612_v0  ;;  %575 = vmatprep.mubr.msk.bf16.mxu1 %vm613_vm0, %v612_v0 }
  0x32   :  { %560 = vmatmul.mubr.bf16.gmra.mxu0 %v609_v13  ;;  %576 = vmatmul.mubr.bf16.gmra.mxu1 %v610_v14 }
  0x33   :  { %563 = vmatprep.mubr.msk.bf16.mxu0 %vm613_vm0, %v612_v0 }
  0x3a   :  { %564 = vmatmul.mubr.bf16.gmra.mxu0 %v611_v15 }
  0xe2   :  { %v204_v17 = vpop.f32.mrf.mxu0  ;;  %v236_v18 = vpop.f32.mrf.mxu1 }
  0xe3   :  { %v311_v19 = vmul.f32 %v694_v16, %v204_v17  ;;  %v319_v21 = vmul.f32 %v694_v16, %v236_v18 }
  0xe4   :  { %v553_v22 = vpop.f32.mrf.mxu0  ;;  %v569_v23 = vpop.f32.mrf.mxu1 }
  0xe5   :  { %v340_v24 = vadd.f32 %v700_v20, %v319_v21  ;;  %v332_v25 = vadd.f32 %v700_v20, %v311_v19 }
  0xe6   :  { %v207_v26 = vpop.f32.mrf.mxu0  ;;  %v239_v27 = vpop.f32.mrf.mxu1 }
  0xe7   :  { %v312_v28 = vmul.f32 %v694_v16, %v207_v26  ;;  %v320_v29 = vmul.f32 %v694_v16, %v239_v27  ;;  %v354_v32 = vmax.f32 %v340_v24, 0.0  ;;  %v346_v35 = vmax.f32 %v332_v25, 0.0 }
  0xe8   :  { %v554_v30 = vpop.f32.mrf.mxu0  ;;  %v570_v31 = vpop.f32.mrf.mxu1 }
  0xe9   :  { %v333_v33 = vadd.f32 %v700_v20, %v312_v28  ;;  %v341_v34 = vadd.f32 %v700_v20, %v320_v29 }
  0xea   :  { %v212_v36 = vpop.f32.mrf.mxu0  ;;  %v244_v37 = vpop.f32.mrf.mxu1 }
  0xeb   :  { %v347_v38 = vmax.f32 %v333_v33, 0.0  ;;  %v355_v39 = vmax.f32 %v341_v34, 0.0  ;;  %v313_v40 = vmul.f32 %v694_v16, %v212_v36  ;;  %v321_v41 = vmul.f32 %v694_v16, %v244_v37 }
  0xec   :  { %v557_v42 = vpop.f32.mrf.mxu0  ;;  %v573_v43 = vpop.f32.mrf.mxu1 }
  0xed   :  { %v482_v44 = vpack.c.bf16 %v347_v38, %v346_v35  ;;  %v502_v45 = vpack.c.bf16 %v355_v39, %v354_v32  ;;  %v342_v46 = vadd.f32 %v700_v20, %v321_v41  ;;  %v334_v47 = vadd.f32 %v700_v20, %v313_v40 }
  0xee   :  { %v215_v48 = vpop.f32.mrf.mxu0  ;;  %v247_v49 = vpop.f32.mrf.mxu1 }
  0xef   :  { %483 = vst [vmem:[%s754_s4] sm:$0xff] %v482_v44   ;;  %517 = vst [vmem:[%s754_s4 + $0x20] sm:$0xff] %v502_v45   ;;  %v314_v50 = vmul.f32 %v694_v16, %v215_v48  ;;  %v322_v51 = vmul.f32 %v694_v16, %v247_v49  ;;  %v356_v54 = vmax.f32 %v342_v46, 0.0  ;;  %v348_v57 = vmax.f32 %v334_v47, 0.0 }
  0xf0   :  { %v558_v52 = vpop.f32.mrf.mxu0  ;;  %v574_v53 = vpop.f32.mrf.mxu1 }
  0xf1   :  { %v335_v55 = vadd.f32 %v700_v20, %v314_v50  ;;  %v343_v56 = vadd.f32 %v700_v20, %v322_v51 }
  0xf2   :  { %v220_v58 = vpop.f32.mrf.mxu0  ;;  %v252_v59 = vpop.f32.mrf.mxu1 }
  0xf3   :  { %v349_v60 = vmax.f32 %v335_v55, 0.0  ;;  %v357_v61 = vmax.f32 %v343_v56, 0.0  ;;  %v315_v62 = vmul.f32 %v694_v16, %v220_v58  ;;  %v323_v63 = vmul.f32 %v694_v16, %v252_v59 }
  0xf4   :  { %v561_v0 = vpop.f32.mrf.mxu0  ;;  %v577_v1 = vpop.f32.mrf.mxu1 }
  0xf5   :  { %v487_v2 = vpack.c.bf16 %v349_v60, %v348_v57  ;;  %v507_v3 = vpack.c.bf16 %v357_v61, %v356_v54  ;;  %v344_v4 = vadd.f32 %v700_v20, %v323_v63  ;;  %v336_v7 = vadd.f32 %v700_v20, %v315_v62 }
  0xf6   :  { %v223_v5 = vpop.f32.mrf.mxu0  ;;  %v255_v6 = vpop.f32.mrf.mxu1 }
  0xf7   :  { %514 = vst [vmem:[%s754_s4 + $0x8] sm:$0xff] %v487_v2   ;;  %518 = vst [vmem:[%s754_s4 + $0x28] sm:$0xff] %v507_v3   ;;  %v316_v8 = vmul.f32 %v694_v16, %v223_v5  ;;  %v324_v9 = vmul.f32 %v694_v16, %v255_v6  ;;  %v358_v12 = vmax.f32 %v344_v4, 0.0  ;;  %v350_v17 = vmax.f32 %v336_v7, 0.0 }
  0xf8   :  { %v562_v10 = vpop.f32.mrf.mxu0  ;;  %v578_v11 = vpop.f32.mrf.mxu1 }
  0xf9   :  { %v337_v13 = vadd.f32 %v700_v20, %v316_v8  ;;  %v345_v14 = vadd.f32 %v700_v20, %v324_v9 }
  0xfa   :  { %v228_v15 = vpop.f32.mrf.mxu0 }
  0xfb   :  { %v351_v18 = vmax.f32 %v337_v13, 0.0  ;;  %v359_v19 = vmax.f32 %v345_v14, 0.0  ;;  %v317_v21 = vmul.f32 %v694_v16, %v228_v15 }
  0xfc   :  { %v565_v22 = vpop.f32.mrf.mxu0 }
  0xfd   :  { %v492_v23 = vpack.c.bf16 %v351_v18, %v350_v17  ;;  %v512_v24 = vpack.c.bf16 %v359_v19, %v358_v12  ;;  %v338_v26 = vadd.f32 %v700_v20, %v317_v21 }
  0xfe   :  { %v231_v25 = vpop.f32.mrf.mxu0 }
  0xff   :  { %515 = vst [vmem:[%s754_s4 + $0x10] sm:$0xff] %v492_v23   ;;  %519 = vst [vmem:[%s754_s4 + $0x30] sm:$0xff] %v512_v24   ;;  %v318_v27 = vmul.f32 %v694_v16, %v231_v25  ;;  %v352_v30 = vmax.f32 %v338_v26, 0.0 }
 0x100   :  { %v566_v28 = vpop.f32.mrf.mxu0 }
 0x101   :  { %v339_v29 = vadd.f32 %v700_v20, %v318_v27 }
 0x103   :  { %v353_v31 = vmax.f32 %v339_v29, 0.0 }
 0x105   :  { %v497_v32 = vpack.c.bf16 %v353_v31, %v352_v30 }
 0x107   :  { %516 = vst [vmem:[%s754_s4 + $0x18] sm:$0xff] %v497_v32  }

// kernel: inception_forward.14
= control target key start
LH: loop header
LB: loop body
LE: loop exit
PB: predicated region body
PF: predicated region fallthrough
CT: control target
= control target key end

     0   :  { %s912_s1 = inlined_call_operand.vmem [shape: bf16[256,128], index: 1, kind: input, shape index: {}]   ;;  %s913_s0 = inlined_call_operand.vmem [shape: bf16[112,256], index: 0, kind: input, shape index: {}]   ;;  %s914_s2 = inlined_call_operand.vmem [shape: f32[1,128], index: 2, kind: input, shape index: {}]   ;;  %s915_s3 = inlined_call_operand.vmem [shape: f32[1,128], index: 3, kind: input, shape index: {}]   ;;  %s916_s4 = inlined_call_operand.vmem [shape: bf16[112,128], index: 4, kind: output, shape index: {}]  }
   0x1   :  { %v701_v0 = vld [vmem:[%s912_s1 + $0x78] sm:$0xff]   ;;  %v703_v2 = vld [vmem:[%s912_s1 + $0x70] sm:$0xff]   ;;  %v705_v4 = vld [vmem:[%s912_s1 + $0x68] sm:$0xff]  }
   0x2   :  { %v702_v1 = vld [vmem:[%s912_s1 + $0x38] sm:$0xff]   ;;  %627 = vmatprep.subr.bf16.mxu0 %v701_v0  ;;  %685 = vmatprep.subr.bf16.mxu1 %v701_v0  ;;  %v704_v3 = vld [vmem:[%s912_s1 + $0x30] sm:$0xff]   ;;  %v706_v5 = vld [vmem:[%s912_s1 + $0x28] sm:$0xff]  }
   0x3   :  { %628 = vmatpush3.bf16.msra.mxu0 %v702_v1  ;;  %693 = vmatpush3.bf16.msra.mxu1 %v702_v1  ;;  %v707_v6 = vld [vmem:[%s912_s1 + $0x60] sm:$0xff]   ;;  %v709_v8 = vld [vmem:[%s912_s1 + $0x58] sm:$0xff]   ;;  %v711_v10 = vld [vmem:[%s912_s1 + $0x50] sm:$0xff]  }
   0x4   :  { %629 = vmatprep.subr.bf16.mxu0 %v703_v2  ;;  %686 = vmatprep.subr.bf16.mxu1 %v703_v2  ;;  %v708_v7 = vld [vmem:[%s912_s1 + $0x20] sm:$0xff]   ;;  %v710_v9 = vld [vmem:[%s912_s1 + $0x18] sm:$0xff]   ;;  %v712_v13 = vld [vmem:[%s912_s1 + $0x10] sm:$0xff]  }
   0x5   :  { %v719_v11 = vld [vmem:[%s913_s0 + $0x4] ss:$8 sps:$4 sm:$0xff]   ;;  %v717_v18 = vld [vmem:[%s913_s0] ss:$8 sps:$4 sm:$0xff]   ;;  %v723_v20 = vld [vmem:[%s913_s0 + $0x14] ss:$8 sps:$4 sm:$0xff]  }
   0x6   :  { %v722_v12 = vld [vmem:[%s913_s0 + $0x44] ss:$8 sps:$4 sm:$0xff]   ;;  %294 = vmatprep.mubr.bf16.mxu0 %v719_v11  ;;  %v720_v19 = vld [vmem:[%s913_s0 + $0x40] ss:$8 sps:$4 sm:$0xff]   ;;  %v726_v21 = vld [vmem:[%s913_s0 + $0x54] ss:$8 sps:$4 sm:$0xff]  }
   0x7   :  { %630 = vmatpush3.bf16.msra.mxu0 %v704_v3  ;;  %694 = vmatpush3.bf16.msra.mxu1 %v704_v3  ;;  %v713_v14 = vld [vmem:[%s912_s1 + $0x48] sm:$0xff]   ;;  %v715_v16 = vld [vmem:[%s912_s1 + $0x40] sm:$0xff]   ;;  %v725_v22 = vld [vmem:[%s913_s0 + $0x10] ss:$8 sps:$4 sm:$0xff]  }
   0x8   :  { %631 = vmatprep.subr.bf16.mxu0 %v705_v4  ;;  %687 = vmatprep.subr.bf16.mxu1 %v705_v4  ;;  %v714_v15 = vld [vmem:[%s912_s1 + $0x8] sm:$0xff]   ;;  %v716_v17 = vld [vmem:[%s912_s1] sm:$0xff]   ;;  %v728_v23 = vld [vmem:[%s913_s0 + $0x50] ss:$8 sps:$4 sm:$0xff]  }
   0x9   :  { %326 = vmatprep.mubr.bf16.mxu1 %v722_v12  ;;  %v729_v24 = vld [vmem:[%s913_s0 + $0x24] ss:$8 sps:$4 sm:$0xff]   ;;  %v731_v26 = vld [vmem:[%s913_s0 + $0x20] ss:$8 sps:$4 sm:$0xff]   ;;  %v735_v28 = vld [vmem:[%s913_s0 + $0x34] ss:$8 sps:$4 sm:$0xff]  }
   0xa   :  { %v732_v25 = vld [vmem:[%s913_s0 + $0x64] ss:$8 sps:$4 sm:$0xff]   ;;  %v734_v27 = vld [vmem:[%s913_s0 + $0x60] ss:$8 sps:$4 sm:$0xff]   ;;  %v737_v29 = vld [vmem:[%s913_s0 + $0x30] ss:$8 sps:$4 sm:$0xff]  }
   0xb   :  { %632 = vmatpush3.bf16.msra.mxu0 %v706_v5  ;;  %695 = vmatpush3.bf16.msra.mxu1 %v706_v5  ;;  %v856_v33 = vld [vmem:[%s914_s2] ss:$0 sm:$0xff] }
   0xc   :  { %633 = vmatprep.subr.bf16.mxu0 %v707_v6  ;;  %688 = vmatprep.subr.bf16.mxu1 %v707_v6  ;;  %v863_v41 = vld [vmem:[%s915_s3] ss:$0 sm:$0xff] }
   0xf   :  { %634 = vmatpush3.bf16.msra.mxu0 %v708_v7  ;;  %696 = vmatpush3.bf16.msra.mxu1 %v708_v7 }
  0x10   :  { %635 = vmatprep.subr.bf16.mxu0 %v709_v8  ;;  %689 = vmatprep.subr.bf16.mxu1 %v709_v8 }
  0x13   :  { %636 = vmatpush3.bf16.msra.mxu0 %v710_v9  ;;  %697 = vmatpush3.bf16.msra.mxu1 %v710_v9 }
  0x14   :  { %637 = vmatprep.subr.bf16.mxu0 %v711_v10  ;;  %690 = vmatprep.subr.bf16.mxu1 %v711_v10 }
  0x17   :  { %638 = vmatpush3.bf16.msra.mxu0 %v712_v13  ;;  %698 = vmatpush3.bf16.msra.mxu1 %v712_v13 }
  0x18   :  { %639 = vmatprep.subr.bf16.mxu0 %v713_v14  ;;  %691 = vmatprep.subr.bf16.mxu1 %v713_v14 }
  0x1b   :  { %640 = vmatpush3.bf16.msra.mxu0 %v714_v15  ;;  %699 = vmatpush3.bf16.msra.mxu1 %v714_v15 }
  0x1c   :  { %641 = vmatprep.subr.bf16.mxu0 %v715_v16  ;;  %692 = vmatprep.subr.bf16.mxu1 %v715_v16 }
  0x1f   :  { %642 = vmatpush3.bf16.msra.mxu0 %v716_v17  ;;  %700 = vmatpush3.bf16.msra.mxu1 %v716_v17 }
  0x22   :  { %295 = vmatmul.mubr.bf16.vlgmr.msra.gmra.mxu0 %v717_v18  ;;  %327 = vmatmul.mubr.bf16.vlgmr.msra.gmra.mxu1 %v720_v19 }
  0x23   :  { %302 = vmatprep.mubr.bf16.mxu0 %v723_v20  ;;  %334 = vmatprep.mubr.bf16.mxu1 %v726_v21 }
  0x2a   :  { %303 = vmatmul.mubr.bf16.gmra.mxu0 %v725_v22  ;;  %335 = vmatmul.mubr.bf16.gmra.mxu1 %v728_v23 }
  0x2b   :  { %310 = vmatprep.mubr.bf16.mxu0 %v729_v24  ;;  %342 = vmatprep.mubr.bf16.mxu1 %v732_v25 }
  0x32   :  { %311 = vmatmul.mubr.bf16.gmra.mxu0 %v731_v26  ;;  %343 = vmatmul.mubr.bf16.gmra.mxu1 %v734_v27 }
  0x33   :  { %318 = vmatprep.mubr.bf16.mxu0 %v735_v28 }
  0x3a   :  { %319 = vmatmul.mubr.bf16.gmra.mxu0 %v737_v29 }
  0xe2   :  { %v643_v30 = vpop.f32.mrf.mxu0  ;;  %v667_v31 = vpop.f32.mrf.mxu1 }
  0xe4   :  { %v644_v32 = vpop.f32.mrf.mxu0  ;;  %v668_v34 = vpop.f32.mrf.mxu1 }
  0xe5   :  { %v645_v35 = vadd.f32 %v644_v32, %v643_v30  ;;  %v669_v36 = vadd.f32 %v668_v34, %v667_v31 }
  0xe6   :  { %v646_v37 = vpop.f32.mrf.mxu0  ;;  %v670_v38 = vpop.f32.mrf.mxu1 }
  0xe7   :  { %v403_v39 = vmul.f32 %v645_v35, %v856_v33  ;;  %v411_v40 = vmul.f32 %v669_v36, %v856_v33 }
  0xe8   :  { %v647_v42 = vpop.f32.mrf.mxu0  ;;  %v671_v43 = vpop.f32.mrf.mxu1 }
  0xe9   :  { %v432_v44 = vadd.f32 %v863_v41, %v411_v40  ;;  %v648_v45 = vadd.f32 %v647_v42, %v646_v37  ;;  %v672_v46 = vadd.f32 %v671_v43, %v670_v38  ;;  %v424_v49 = vadd.f32 %v863_v41, %v403_v39 }
  0xea   :  { %v649_v47 = vpop.f32.mrf.mxu0  ;;  %v673_v48 = vpop.f32.mrf.mxu1 }
  0xeb   :  { %v404_v50 = vmul.f32 %v648_v45, %v856_v33  ;;  %v412_v51 = vmul.f32 %v672_v46, %v856_v33  ;;  %v446_v52 = vmax.f32 %v432_v44, 0.0  ;;  %v438_v61 = vmax.f32 %v424_v49, 0.0 }
  0xec   :  { %v650_v53 = vpop.f32.mrf.mxu0  ;;  %v674_v54 = vpop.f32.mrf.mxu1 }
  0xed   :  { %v425_v55 = vadd.f32 %v863_v41, %v404_v50  ;;  %v433_v56 = vadd.f32 %v863_v41, %v412_v51  ;;  %v651_v57 = vadd.f32 %v650_v53, %v649_v47  ;;  %v675_v58 = vadd.f32 %v674_v54, %v673_v48 }
  0xee   :  { %v652_v59 = vpop.f32.mrf.mxu0  ;;  %v676_v60 = vpop.f32.mrf.mxu1 }
  0xef   :  { %v439_v62 = vmax.f32 %v425_v55, 0.0  ;;  %v447_v63 = vmax.f32 %v433_v56, 0.0  ;;  %v413_v0 = vmul.f32 %v675_v58, %v856_v33  ;;  %v405_v1 = vmul.f32 %v651_v57, %v856_v33 }
  0xf0   :  { %v653_v2 = vpop.f32.mrf.mxu0  ;;  %v677_v3 = vpop.f32.mrf.mxu1 }
  0xf1   :  { %v589_v4 = vpack.c.bf16 %v439_v62, %v438_v61  ;;  %v609_v5 = vpack.c.bf16 %v447_v63, %v446_v52  ;;  %v434_v6 = vadd.f32 %v863_v41, %v413_v0  ;;  %v654_v7 = vadd.f32 %v653_v2, %v652_v59 }
  0xf2   :  { %v655_v8 = vpop.f32.mrf.mxu0  ;;  %v678_v9 = vadd.f32 %v677_v3, %v676_v60  ;;  %v679_v10 = vpop.f32.mrf.mxu1  ;;  %v426_v11 = vadd.f32 %v863_v41, %v405_v1 }
  0xf3   :  { %590 = vst [vmem:[%s916_s4] sm:$0xff] %v589_v4   ;;  %624 = vst [vmem:[%s916_s4 + $0x20] sm:$0xff] %v609_v5   ;;  %v406_v12 = vmul.f32 %v654_v7, %v856_v33  ;;  %v448_v18 = vmax.f32 %v434_v6, 0.0 }
  0xf4   :  { %v414_v13 = vmul.f32 %v678_v9, %v856_v33  ;;  %v656_v14 = vpop.f32.mrf.mxu0  ;;  %v680_v15 = vpop.f32.mrf.mxu1  ;;  %v440_v25 = vmax.f32 %v426_v11, 0.0 }
  0xf5   :  { %v657_v16 = vadd.f32 %v656_v14, %v655_v8  ;;  %v681_v17 = vadd.f32 %v680_v15, %v679_v10  ;;  %v427_v19 = vadd.f32 %v863_v41, %v406_v12 }
  0xf6   :  { %v435_v20 = vadd.f32 %v863_v41, %v414_v13  ;;  %v658_v21 = vpop.f32.mrf.mxu0  ;;  %v682_v22 = vpop.f32.mrf.mxu1 }
  0xf7   :  { %v407_v23 = vmul.f32 %v657_v16, %v856_v33  ;;  %v415_v24 = vmul.f32 %v681_v17, %v856_v33  ;;  %v441_v26 = vmax.f32 %v427_v19, 0.0 }
  0xf8   :  { %v449_v27 = vmax.f32 %v435_v20, 0.0  ;;  %v659_v28 = vpop.f32.mrf.mxu0  ;;  %v683_v29 = vpop.f32.mrf.mxu1 }
  0xf9   :  { %v436_v30 = vadd.f32 %v863_v41, %v415_v24  ;;  %v660_v31 = vadd.f32 %v659_v28, %v658_v21  ;;  %v684_v32 = vadd.f32 %v683_v29, %v682_v22  ;;  %v594_v34 = vpack.c.bf16 %v441_v26, %v440_v25 }
  0xfa   :  { %v614_v35 = vpack.c.bf16 %v449_v27, %v448_v18  ;;  %v661_v36 = vpop.f32.mrf.mxu0  ;;  %v428_v37 = vadd.f32 %v863_v41, %v407_v23 }
  0xfb   :  { %v408_v38 = vmul.f32 %v660_v31, %v856_v33  ;;  %v416_v39 = vmul.f32 %v684_v32, %v856_v33  ;;  %621 = vst [vmem:[%s916_s4 + $0x8] sm:$0xff] %v594_v34   ;;  %v450_v42 = vmax.f32 %v436_v30, 0.0 }
  0xfc   :  { %625 = vst [vmem:[%s916_s4 + $0x28] sm:$0xff] %v614_v35   ;;  %v662_v40 = vpop.f32.mrf.mxu0  ;;  %v442_v47 = vmax.f32 %v428_v37, 0.0 }
  0xfd   :  { %v429_v43 = vadd.f32 %v863_v41, %v408_v38  ;;  %v437_v44 = vadd.f32 %v863_v41, %v416_v39  ;;  %v663_v45 = vadd.f32 %v662_v40, %v661_v36 }
  0xfe   :  { %v664_v46 = vpop.f32.mrf.mxu0 }
  0xff   :  { %v443_v48 = vmax.f32 %v429_v43, 0.0  ;;  %v451_v49 = vmax.f32 %v437_v44, 0.0  ;;  %v409_v50 = vmul.f32 %v663_v45, %v856_v33 }
 0x100   :  { %v665_v51 = vpop.f32.mrf.mxu0 }
 0x101   :  { %v599_v52 = vpack.c.bf16 %v443_v48, %v442_v47  ;;  %v619_v53 = vpack.c.bf16 %v451_v49, %v450_v42  ;;  %v666_v54 = vadd.f32 %v665_v51, %v664_v46  ;;  %v430_v55 = vadd.f32 %v863_v41, %v409_v50 }
 0x103   :  { %622 = vst [vmem:[%s916_s4 + $0x10] sm:$0xff] %v599_v52   ;;  %626 = vst [vmem:[%s916_s4 + $0x30] sm:$0xff] %v619_v53   ;;  %v410_v56 = vmul.f32 %v666_v54, %v856_v33  ;;  %v444_v58 = vmax.f32 %v430_v55, 0.0 }
 0x105   :  { %v431_v57 = vadd.f32 %v863_v41, %v410_v56 }
 0x107   :  { %v445_v59 = vmax.f32 %v431_v57, 0.0 }
 0x109   :  { %v604_v60 = vpack.c.bf16 %v445_v59, %v444_v58 }
 0x10b   :  { %623 = vst [vmem:[%s916_s4 + $0x18] sm:$0xff] %v604_v60  }

// kernel: inception_forward.17
= control target key start
LH: loop header
LB: loop body
LE: loop exit
PB: predicated region body
PF: predicated region fallthrough
CT: control target
= control target key end

     0   :  { %s412_s6 = smov 0   ;;  %s494_s0 = inlined_call_operand.vmem [shape: bf16[2,9,9,16], index: 0, kind: input, shape index: {}]   ;;  %s495_s1 = inlined_call_operand.vmem [shape: bf16[2,7,7,16], index: 1, kind: output, shape index: {}]  }
   0x1 LB: > { %s375_s7 = sadd.s32 4294967295, %s400_s6   ;;  %p379_p0 = scmp.ge.s32.totalorder %s400_s6, 1  ;;  %s400_s6 = sphi %s412_s6, %s11_s6  }
   0x2   : > { %p87_p1 = scmp.lt.s32.totalorder %s400_s6, 3 }
   0x4   : > { %p88_p2 = pnand %p379_p0, %p87_p1 }
   0x5   : > { %p107_p3 = scmp.lt.s32.totalorder (!%p88_p2), %s375_s7, 1 }
   0x6   : > { %91 = sbr.rel (%p88_p2) target bundleno = 59 (0x3b), region = 24 }
   0xb   : > { %s499_s7 = smov (!%p107_p3, %s375_s7), 1  ;;  %vm188_vm0 = vcmask 1045504   ;;  %vm296_vm1 = vcmask 125952   ;;  %vm297_vm2 = vsmask.f32 3328 }
   0xc   : > { %s384_s8 = smul.u32 72, %s499_s7  ;;  %vm454_vm3 = vmand %vm296_vm1, %vm297_vm2 }
   0xd   : > { %s385_s12 = smul.u32 28, %s499_s7 }
   0xe   : > { %s426_s11 = scalar_lea.vmem %s494_s0, %s384_s8 }
   0xf   : > { %v117_v0 = vld [vmem:[%s426_s11] ss:$8 sps:$4 sm:$0xff]   ;;  %v118_v1 = vld [vmem:[%s426_s11 + $0x4] sm:$0x1]  ;;  %v120_v2 = vld [vmem:[%s426_s11 + $0xc] sm:$0x1]  ;;  %s448_s15 = scalar_lea.vmem %s495_s1, %s385_s12 }
  0x10   : > { %v121_v3 = vld [vmem:[%s426_s11 + $0x10] ss:$8 sps:$4 sm:$0xff]   ;;  %v122_v4 = vld [vmem:[%s426_s11 + $0x14] sm:$0x1]  ;;  %v135_v5 = vunpack.c.l.bf16 %v117_v0  ;;  %v136_v6 = vunpack.c.l.bf16 %v118_v1  ;;  %v137_v7 = vunpack.c.h.bf16 %v117_v0  ;;  %v138_v8 = vunpack.c.l.bf16 %v120_v2  ;;  %v124_v12 = vld [vmem:[%s426_s11 + $0x1c] sm:$0x1] }
  0x11   : > { %v139_v9 = vunpack.c.l.bf16 %v121_v3  ;;  %v140_v10 = vunpack.c.l.bf16 %v122_v4  ;;  %v141_v11 = vunpack.c.h.bf16 %v121_v3  ;;  %v125_v17 = vld [vmem:[%s426_s11 + $0x20] ss:$8 sps:$4 sm:$0xff]   ;;  %v126_v26 = vld [vmem:[%s426_s11 + $0x24] sm:$0x1]  ;;  %v142_v29 = vunpack.c.l.bf16 %v124_v12  ;;  %v128_v43 = vld [vmem:[%s426_s11 + $0x2c] sm:$0x1] }
  0x12   : > { %v160_v13 = vrot.slane %v135_v5, 1  ;;  %v161_v14 = vrot.slane %v137_v7, 1  ;;  %v189_v15 = vrot.slane %v135_v5, 2  ;;  %v190_v16 = vrot.slane %v136_v6, 2  ;;  %v129_v44 = vld [vmem:[%s426_s11 + $0x30] ss:$8 sps:$4 sm:$0xff]  }
  0x13   : > { %v162_v18 = vrot.slane %v139_v9, 1  ;;  %v192_v19 = vrot.slane %v137_v7, 2  ;;  %v193_v20 = vrot.slane %v138_v8, 2  ;;  %v195_v21 = vrot.slane %v139_v9, 2  ;;  %v130_v61 = vld [vmem:[%s426_s11 + $0x34] sm:$0x1] }
  0x14   : > { %v174_v22 = vadd.f32 %v160_v13, %v135_v5  ;;  %v175_v23 = vadd.f32 %v161_v14, %v137_v7  ;;  %v191_v24 = vsel %vm188_vm0, %v189_v15, %v190_v16  ;;  %v196_v25 = vrot.slane %v140_v10, 2 }
  0x15   : > { %v176_v27 = vadd.f32 %v162_v18, %v139_v9  ;;  %v194_v28 = vsel %vm188_vm0, %v192_v19, %v193_v20  ;;  %v143_v30 = vunpack.c.l.bf16 %v125_v17  ;;  %v163_v34 = vrot.slane %v141_v11, 1 }
  0x16   : > { %v197_v31 = vsel %vm188_vm0, %v195_v21, %v196_v25  ;;  %v217_v32 = vadd.f32 %v191_v24, %v174_v22  ;;  %v218_v33 = vadd.f32 %v194_v28, %v175_v23  ;;  %v198_v36 = vrot.slane %v141_v11, 2  ;;  %v299_v23 = vld [vmem:[%s448_s15] sm:$0xf] }
  0x17   : > { %v219_v35 = vadd.f32 %v197_v31, %v176_v27  ;;  %v199_v37 = vrot.slane %v142_v29, 2  ;;  %v144_v38 = vunpack.c.l.bf16 %v126_v26  ;;  %v177_v41 = vadd.f32 %v163_v34, %v141_v11 }
  0x18   : > { %v224_v39 = vadd.f32 %v217_v32, %v137_v7  ;;  %v225_v40 = vadd.f32 %v218_v33, %v139_v9  ;;  %v145_v42 = vunpack.c.h.bf16 %v125_v17  ;;  %v164_v47 = vrot.slane %v143_v30, 1 }
  0x19   : > { %v226_v45 = vadd.f32 %v219_v35, %v141_v11  ;;  %v200_v46 = vsel %vm188_vm0, %v198_v36, %v199_v37  ;;  %v201_v48 = vrot.slane %v143_v30, 2  ;;  %v202_v52 = vrot.slane %v144_v38, 2  ;;  %v132_v36 = vld [vmem:[%s426_s11 + $0x3c] sm:$0x1] }
  0x1a   : > { %v234_v49 = vadd.f32 %v224_v39, %v161_v14  ;;  %v235_v50 = vadd.f32 %v225_v40, %v162_v18  ;;  %v220_v51 = vadd.f32 %v200_v46, %v177_v41  ;;  %v178_v54 = vadd.f32 %v164_v47, %v143_v30  ;;  %v305_v40 = vld [vmem:[%s448_s15 + $0x8] sm:$0xf] }
  0x1b   : > { %v236_v53 = vadd.f32 %v226_v45, %v163_v34  ;;  %v146_v55 = vunpack.c.l.bf16 %v128_v43  ;;  %v147_v56 = vunpack.c.l.bf16 %v129_v44  ;;  %v203_v60 = vsel %vm188_vm0, %v201_v48, %v202_v52  ;;  %v134_v52 = vld [vmem:[%s426_s11 + $0x44] sm:$0x1] }
  0x1c   : > { %v246_v57 = vadd.f32 %v234_v49, %v194_v28  ;;  %v247_v58 = vadd.f32 %v235_v50, %v197_v31  ;;  %v227_v59 = vadd.f32 %v220_v51, %v143_v30  ;;  %v221_v63 = vadd.f32 %v203_v60, %v178_v54  ;;  %v133_v51 = vld [vmem:[%s426_s11 + $0x40] sm:$0xf]  ;;  %v308_v54 = vld [vmem:[%s448_s15 + $0xc] sm:$0xf] }
  0x1d   : > { %v248_v62 = vadd.f32 %v236_v53, %v200_v46  ;;  %v165_v0 = vrot.slane %v145_v42, 1  ;;  %v204_v1 = vrot.slane %v145_v42, 2  ;;  %v205_v5 = vrot.slane %v146_v55, 2 }
  0x1e   : > { %v253_v2 = vadd.f32 %v246_v57, %v139_v9  ;;  %v254_v3 = vadd.f32 %v247_v58, %v141_v11  ;;  %v237_v4 = vadd.f32 %v227_v59, %v164_v47  ;;  %v228_v6 = vadd.f32 %v221_v63, %v145_v42 }
  0x1f   : > { %v255_v7 = vadd.f32 %v248_v62, %v143_v30  ;;  %v179_v8 = vadd.f32 %v165_v0, %v145_v42  ;;  %v148_v10 = vunpack.c.l.bf16 %v130_v61  ;;  %v206_v15 = vsel %vm188_vm0, %v204_v1, %v205_v5 }
  0x20   : > { %v263_v12 = vadd.f32 %v253_v2, %v162_v18  ;;  %v264_v13 = vadd.f32 %v254_v3, %v163_v34  ;;  %v249_v14 = vadd.f32 %v237_v4, %v203_v60  ;;  %v238_v11 = vadd.f32 %v228_v6, %v165_v0  ;;  %v311_v3 = vld [vmem:[%s448_s15 + $0x10] sm:$0xf] }
  0x21   : > { %v265_v16 = vadd.f32 %v255_v7, %v164_v47  ;;  %v222_v9 = vadd.f32 %v206_v15, %v179_v8  ;;  %v166_v17 = vrot.slane %v147_v56, 1  ;;  %v207_v22 = vrot.slane %v147_v56, 2 }
  0x22   : > { %v275_v19 = vadd.f32 %v263_v12, %v197_v31  ;;  %v276_v20 = vadd.f32 %v264_v13, %v200_v46  ;;  %v256_v21 = vadd.f32 %v249_v14, %v145_v42  ;;  %v250_v26 = vadd.f32 %v238_v11, %v206_v15  ;;  %v302_v31 = vld [vmem:[%s448_s15 + $0x4] sm:$0xf]  ;;  %v314_v11 = vld [vmem:[%s448_s15 + $0x14] sm:$0xf] }
  0x23   : > { %v277_v24 = vadd.f32 %v265_v16, %v203_v60  ;;  %v229_v25 = vadd.f32 %v222_v9, %v147_v56  ;;  %v180_v18 = vadd.f32 %v166_v17, %v147_v56  ;;  %v208_v30 = vrot.slane %v148_v10, 2 }
  0x24   : > { %v282_v27 = vmul.f32 0.11111111, %v275_v19  ;;  %v283_v28 = vmul.f32 0.11111111, %v276_v20  ;;  %v266_v29 = vadd.f32 %v256_v21, %v165_v0  ;;  %v257_v35 = vadd.f32 %v250_v26, %v147_v56 }
  0x25   : > { %v284_v33 = vmul.f32 0.11111111, %v277_v24  ;;  %v239_v34 = vadd.f32 %v229_v25, %v166_v17  ;;  %v149_v37 = vunpack.c.h.bf16 %v129_v44  ;;  %v209_v42 = vsel %vm188_vm0, %v207_v22, %v208_v30 }
  0x26   : > { %v289_v38 = vpack.c.bf16 %v282_v27, %v282_v27  ;;  %v290_v39 = vpack.c.bf16 %v283_v28, %v283_v28  ;;  %v278_v41 = vadd.f32 %v266_v29, %v206_v15  ;;  %v223_v45 = vadd.f32 %v209_v42, %v180_v18 }
  0x27   : > { %v291_v43 = vpack.c.bf16 %v284_v33, %v284_v33  ;;  %v251_v46 = vadd.f32 %v239_v34, %v209_v42  ;;  %v267_v47 = vadd.f32 %v257_v35, %v166_v17  ;;  %v150_v50 = vunpack.c.l.bf16 %v132_v36 }
  0x28   : > { %v300_v48 = vsel %vm454_vm3, %v289_v38, %v299_v23  ;;  %v303_v44 = vsel %vm454_vm3, %v290_v39, %v302_v31  ;;  %v285_v49 = vmul.f32 0.11111111, %v278_v41  ;;  %v230_v56 = vadd.f32 %v223_v45, %v149_v37  ;;  %v317_v23 = vld [vmem:[%s448_s15 + $0x18] sm:$0xf] }
  0x29   : > { %301 = vst [vmem:[%s448_s15] sm:$0xf] %v300_v48  ;;  %304 = vst [vmem:[%s448_s15 + $0x4] sm:$0xf] %v303_v44  ;;  %v306_v53 = vsel %vm454_vm3, %v291_v43, %v305_v40  ;;  %v279_v55 = vadd.f32 %v267_v47, %v209_v42  ;;  %v232_v57 = vrot.slane %v149_v37, 1  ;;  %v242_v59 = vrot.slane %v149_v37, 2 }
  0x2a   : > { %307 = vst [vmem:[%s448_s15 + $0x8] sm:$0xf] %v306_v53  ;;  %v292_v58 = vpack.c.bf16 %v285_v49, %v285_v49  ;;  %v243_v60 = vrot.slane %v150_v50, 2  ;;  %v258_v61 = vadd.f32 %v251_v46, %v149_v37  ;;  %v151_v0 = vunpack.c.l.bf16 %v133_v51 }
  0x2b   : > { %v286_v62 = vmul.f32 0.11111111, %v279_v55  ;;  %v240_v63 = vadd.f32 %v232_v57, %v230_v56  ;;  %v152_v1 = vunpack.c.l.bf16 %v134_v52 }
  0x2c   : > { %v309_v2 = vsel %vm454_vm3, %v292_v58, %v308_v54  ;;  %v244_v4 = vsel %vm188_vm0, %v242_v59, %v243_v60  ;;  %v268_v5 = vadd.f32 %v258_v61, %v232_v57  ;;  %v261_v8 = vrot.slane %v151_v0, 1 }
  0x2d   : > { %310 = vst [vmem:[%s448_s15 + $0xc] sm:$0xf] %v309_v2  ;;  %v293_v6 = vpack.c.bf16 %v286_v62, %v286_v62  ;;  %v252_v7 = vadd.f32 %v244_v4, %v240_v63  ;;  %v271_v10 = vrot.slane %v151_v0, 2  ;;  %v272_v13 = vrot.slane %v152_v1, 2 }
  0x2e   : > { %v280_v12 = vadd.f32 %v268_v5, %v244_v4 }
  0x2f   : > { %v312_v14 = vsel %vm454_vm3, %v293_v6, %v311_v3  ;;  %v259_v15 = vadd.f32 %v252_v7, %v151_v0  ;;  %v273_v9 = vsel %vm188_vm0, %v271_v10, %v272_v13 }
  0x30   : > { %313 = vst [vmem:[%s448_s15 + $0x10] sm:$0xf] %v312_v14  ;;  %v287_v16 = vmul.f32 0.11111111, %v280_v12 }
  0x31   : > { %v269_v17 = vadd.f32 %v261_v8, %v259_v15 }
  0x32   : > { %v294_v19 = vpack.c.bf16 %v287_v16, %v287_v16 }
  0x33   : > { %v281_v20 = vadd.f32 %v273_v9, %v269_v17 }
  0x34   : > { %v315_v21 = vsel %vm454_vm3, %v294_v19, %v314_v11 }
  0x35   : > { %316 = vst [vmem:[%s448_s15 + $0x14] sm:$0xf] %v315_v21  ;;  %v288_v22 = vmul.f32 0.11111111, %v281_v20 }
  0x37   : > { %v295_v24 = vpack.c.bf16 %v288_v22, %v288_v22 }
  0x39   : > { %v318_v25 = vsel %vm454_vm3, %v295_v24, %v317_v23 }
  0x3a   : > { %319 = vst [vmem:[%s448_s15 + $0x18] sm:$0xf] %v318_v25 }
  0x3b PF: > { %s11_s6 = sadd.s32 1, %s400_s6  }
  0x3c   : > { %p8_p4 = scmp.ge.s32.totalorder %s11_s6, 4  }
  0x3e   :  { %10 = sbr.rel (!%p8_p4) target bundleno = 1 (0x1), region = 54 }

// kernel: inception_forward.19
= control target key start
LH: loop header
LB: loop body
LE: loop exit
PB: predicated region body
PF: predicated region fallthrough
CT: control target
= control target key end

     0   :  { %v620_v1 = vmov 0.0   ;;  %vm131_vm0 = vcmask 1040384   ;;  %vm621_vm1 = vmmov 0   ;;  %vm304_vm2 = vcmask 1041409   ;;  %s1119_s1 = inlined_call_operand.vmem [shape: f32[128,384], index: 1, kind: input, shape index: {}]   ;;  %s1120_s0 = inlined_call_operand.vmem [shape: bf16[8,49,128], index: 0, kind: input, shape index: {}]   ;;  %s1121_s2 = inlined_call_operand.vmem [shape: f32[1,384], index: 2, kind: input, shape index: {}]   ;;  %s1122_s3 = inlined_call_operand.vmem [shape: f32[8,384], index: 3, kind: output, shape index: {}]  }
   0x1   :  { %v277_v0 = vld [vmem:[%s1119_s1 + $0x170] sm:$0xff]  ;;  %583 = vmatprep.subr.mxu1 %v620_v1  ;;  %v276_v2 = vld [vmem:[%s1119_s1 + $0x168] sm:$0xff]  ;;  %v278_v3 = vld [vmem:[%s1119_s1 + $0x178] sm:$0xff]  ;;  %383 = vmatprep.mubr.f32.mxu0 %v620_v1  ;;  %vm306_vm3 = vcmask 1042434   ;;  %vm308_vm4 = vcmask 1043459   ;;  %vm310_vm5 = vcmask 1044484  }
   0x2   :  { %319 = vmatprep.subr.mxu0 %v277_v0  ;;  %584 = vmatpush3.msra.mxu1 %v278_v3  ;;  %v274_v4 = vld [vmem:[%s1119_s1 + $0x158] sm:$0xff]  ;;  %v273_v5 = vld [vmem:[%s1119_s1 + $0x150] sm:$0xff]  ;;  %v275_v6 = vld [vmem:[%s1119_s1 + $0x160] sm:$0xff]  ;;  %vm312_vm6 = vcmask 1045509   ;;  %vm314_vm7 = vcmask 1046534   ;;  %vm316_vm8 = vcmask 1047559  }
   0x3   :  { %320 = vmatpush1.msra.mxu0 %v276_v2  ;;  %585 = vmatprep.subr.mxu1 %v620_v1  ;;  %v271_v7 = vld [vmem:[%s1119_s1 + $0x140] sm:$0xff]  ;;  %v272_v8 = vld [vmem:[%s1119_s1 + $0x148] sm:$0xff]  ;;  %v270_v9 = vld [vmem:[%s1119_s1 + $0x138] sm:$0xff] }
   0x4   :  { %321 = vmatprep.subr.mxu0 %v274_v4  ;;  %586 = vmatpush3.msra.mxu1 %v275_v6  ;;  %v268_v10 = vld [vmem:[%s1119_s1 + $0x128] sm:$0xff]  ;;  %v269_v11 = vld [vmem:[%s1119_s1 + $0x130] sm:$0xff]  ;;  %v267_v12 = vld [vmem:[%s1119_s1 + $0x120] sm:$0xff] }
   0x5   :  { %322 = vmatpush1.msra.mxu0 %v273_v5  ;;  %587 = vmatprep.subr.mxu1 %v620_v1  ;;  %v265_v13 = vld [vmem:[%s1119_s1 + $0x110] sm:$0xff]  ;;  %v266_v14 = vld [vmem:[%s1119_s1 + $0x118] sm:$0xff]  ;;  %v264_v15 = vld [vmem:[%s1119_s1 + $0x108] sm:$0xff] }
   0x6   :  { %323 = vmatprep.subr.mxu0 %v271_v7  ;;  %588 = vmatpush3.msra.mxu1 %v272_v8  ;;  %v262_v16 = vld [vmem:[%s1119_s1 + $0xf8] sm:$0xff]  ;;  %v263_v17 = vld [vmem:[%s1119_s1 + $0x100] sm:$0xff]  ;;  %v261_v18 = vld [vmem:[%s1119_s1 + $0xf0] sm:$0xff] }
   0x7   :  { %324 = vmatpush1.msra.mxu0 %v270_v9  ;;  %589 = vmatprep.subr.mxu1 %v620_v1  ;;  %v259_v19 = vld [vmem:[%s1119_s1 + $0xe0] sm:$0xff]  ;;  %v260_v20 = vld [vmem:[%s1119_s1 + $0xe8] sm:$0xff]  ;;  %v258_v21 = vld [vmem:[%s1119_s1 + $0xd8] sm:$0xff] }
   0x8   :  { %325 = vmatprep.subr.mxu0 %v268_v10  ;;  %590 = vmatpush3.msra.mxu1 %v269_v11  ;;  %v256_v22 = vld [vmem:[%s1119_s1 + $0xc8] sm:$0xff]  ;;  %v257_v23 = vld [vmem:[%s1119_s1 + $0xd0] sm:$0xff]  ;;  %v255_v24 = vld [vmem:[%s1119_s1 + $0xc0] sm:$0xff] }
   0x9   :  { %326 = vmatpush1.msra.mxu0 %v267_v12  ;;  %591 = vmatprep.subr.mxu1 %v620_v1  ;;  %v253_v25 = vld [vmem:[%s1119_s1 + $0xb0] sm:$0xff]  ;;  %v252_v26 = vld [vmem:[%s1119_s1 + $0xa8] sm:$0xff]  ;;  %v254_v27 = vld [vmem:[%s1119_s1 + $0xb8] sm:$0xff] }
   0xa   :  { %327 = vmatprep.subr.mxu0 %v265_v13  ;;  %592 = vmatpush3.msra.mxu1 %v266_v14  ;;  %v250_v28 = vld [vmem:[%s1119_s1 + $0x98] sm:$0xff]  ;;  %v249_v29 = vld [vmem:[%s1119_s1 + $0x90] sm:$0xff]  ;;  %v251_v30 = vld [vmem:[%s1119_s1 + $0xa0] sm:$0xff] }
   0xb   :  { %328 = vmatpush1.msra.mxu0 %v264_v15  ;;  %593 = vmatprep.subr.mxu1 %v620_v1  ;;  %v247_v31 = vld [vmem:[%s1119_s1 + $0x80] sm:$0xff]  ;;  %v753_v33 = vld [vmem:[%s1120_s0 + $0x8] sm:$0xff]   ;;  %v758_v34 = vld [vmem:[%s1120_s0 + $0x10] sm:$0xff]  }
   0xc   :  { %329 = vmatprep.subr.mxu0 %v262_v16  ;;  %594 = vmatpush3.msra.mxu1 %v263_v17  ;;  %v748_v32 = vld [vmem:[%s1120_s0] sm:$0xff]   ;;  %v246_v35 = vld [vmem:[%s1119_s1 + $0x78] sm:$0xff]  ;;  %v248_v36 = vld [vmem:[%s1119_s1 + $0x88] sm:$0xff]  ;;  %v473_v39 = vunpack.c.l.bf16 %v753_v33 }
   0xd   :  { %330 = vmatpush1.msra.mxu0 %v261_v18  ;;  %595 = vmatprep.subr.mxu1 %v620_v1  ;;  %v469_v37 = vunpack.c.l.bf16 %v748_v32  ;;  %v470_v38 = vunpack.c.h.bf16 %v748_v32  ;;  %v773_v41 = vld [vmem:[%s1120_s0 + $0x20] sm:$0xff]   ;;  %v244_v42 = vld [vmem:[%s1119_s1 + $0x68] sm:$0xff]  ;;  %v245_v43 = vld [vmem:[%s1119_s1 + $0x70] sm:$0xff] }
   0xe   :  { %331 = vmatprep.subr.mxu0 %v259_v19  ;;  %596 = vmatpush3.msra.mxu1 %v260_v20  ;;  %v481_v46 = vunpack.c.l.bf16 %v773_v41  ;;  %v482_v47 = vunpack.c.h.bf16 %v773_v41  ;;  %v789_v48 = vld [vmem:[%s1120_s0 + $0x28] sm:$0xff]   ;;  %v794_v49 = vld [vmem:[%s1120_s0 + $0x38] sm:$0xff]   ;;  %v243_v50 = vld [vmem:[%s1119_s1 + $0x60] sm:$0xff]  ;;  %v1123_v41 = vunpack.c.h.bf16 %v753_v33 }
   0xf   :  { %332 = vmatpush1.msra.mxu0 %v258_v21  ;;  %597 = vmatprep.subr.mxu1 %v620_v1  ;;  %v802_v51 = vld [vmem:[%s1120_s0 + $0x18] sm:$0x1]  ;;  %v489_v54 = vunpack.c.l.bf16 %v794_v49  ;;  %v490_v55 = vunpack.c.h.bf16 %v794_v49  ;;  %v811_v56 = vld [vmem:[%s1120_s0 + $0x40] sm:$0xff]   ;;  %v816_v57 = vld [vmem:[%s1120_s0 + $0x48] sm:$0xff]  }
  0x10   :  { %333 = vmatprep.subr.mxu0 %v256_v22  ;;  %598 = vmatpush3.msra.mxu1 %v257_v23  ;;  %v241_v58 = vld [vmem:[%s1119_s1 + $0x50] sm:$0xff]  ;;  %v493_v60 = vunpack.c.l.bf16 %v811_v56  ;;  %v834_v0 = vld [vmem:[%s1120_s0 + $0x58] sm:$0xff]   ;;  %v839_v2 = vld [vmem:[%s1120_s0 + $0x60] sm:$0xff]  }
  0x11   :  { %334 = vmatpush1.msra.mxu0 %v255_v24  ;;  %599 = vmatprep.subr.mxu1 %v620_v1  ;;  %v825_v59 = vld [vmem:[%s1120_s0 + $0x1c] ss:$20 sps:$4 sm:$0xff]   ;;  %v240_v3 = vld [vmem:[%s1119_s1 + $0x48] sm:$0xff]  ;;  %v501_v5 = vunpack.c.l.bf16 %v834_v0  ;;  %v502_v6 = vunpack.c.h.bf16 %v834_v0  ;;  %v239_v12 = vld [vmem:[%s1119_s1 + $0x40] sm:$0xff]  ;;  %v153_v32 = vadd.f32 %v490_v55, %v489_v54 }
  0x12   :  { %335 = vmatprep.subr.mxu0 %v253_v25  ;;  %600 = vmatpush3.msra.mxu1 %v254_v27  ;;  %v242_v4 = vld [vmem:[%s1119_s1 + $0x58] sm:$0xff]  ;;  %v854_v9 = vld [vmem:[%s1120_s0 + $0x70] sm:$0xff]   ;;  %v880_v18 = vld [vmem:[%s1120_s0 + $0x80] sm:$0xff]   ;;  %v77_v27 = vunpack.c.l.bf16 %v825_v59 }
  0x13   :  { %336 = vmatpush1.msra.mxu0 %v252_v26  ;;  %601 = vmatprep.subr.mxu1 %v620_v1  ;;  %v859_v10 = vld [vmem:[%s1120_s0 + $0x78] sm:$0xff]   ;;  %v871_v13 = vld [vmem:[%s1120_s0 + $0x34] sm:$0x1]  ;;  %v509_v14 = vunpack.c.l.bf16 %v854_v9  ;;  %v510_v15 = vunpack.c.h.bf16 %v854_v9  ;;  %v888_v20 = vld [vmem:[%s1120_s0 + $0x50] sm:$0x1]  ;;  %v76_v26 = vunpack.c.l.bf16 %v802_v51  ;;  %v154_v54 = vadd.f32 %v493_v60, %v153_v32 }
  0x14   :  { %337 = vmatprep.subr.mxu0 %v250_v28  ;;  %602 = vmatpush3.msra.mxu1 %v251_v30  ;;  %v238_v11 = vld [vmem:[%s1119_s1 + $0x38] sm:$0xff]  ;;  %v237_v19 = vld [vmem:[%s1119_s1 + $0x30] sm:$0xff]  ;;  %v235_v28 = vld [vmem:[%s1119_s1 + $0x20] sm:$0xff] }
  0x15   :  { %338 = vmatpush1.msra.mxu0 %v249_v29  ;;  %603 = vmatprep.subr.mxu1 %v620_v1  ;;  %v893_v21 = vld [vmem:[%s1120_s0 + $0x54] ss:$20 sps:$4 sm:$0xff]   ;;  %v905_v25 = vld [vmem:[%s1120_s0 + $0x98] sm:$0xff]   ;;  %v957_v8 = vld [vmem:[%s1120_s0 + $0x8c] ss:$20 sps:$4 sm:$0xff]  }
  0x16   :  { %339 = vmatprep.subr.mxu0 %v247_v31  ;;  %604 = vmatpush3.msra.mxu1 %v248_v36  ;;  %v900_v24 = vld [vmem:[%s1120_s0 + $0x90] sm:$0xff]   ;;  %v236_v29 = vld [vmem:[%s1119_s1 + $0x28] sm:$0xff]  ;;  %v234_v23 = vld [vmem:[%s1119_s1 + $0x18] sm:$0xff]  ;;  %v91_v7 = vunpack.c.l.bf16 %v893_v21  ;;  %v96_v61 = vunpack.c.h.bf16 %v893_v21  ;;  %v105_v22 = vunpack.c.l.bf16 %v957_v8  ;;  %v110_v16 = vunpack.c.h.bf16 %v957_v8 }
  0x17   :  { %340 = vmatpush1.msra.mxu0 %v246_v35  ;;  %605 = vmatprep.subr.mxu1 %v620_v1  ;;  %v521_v30 = vunpack.c.l.bf16 %v900_v24  ;;  %v41_v36 = vld [vmem:[%s1120_s0 + $0x6c] sm:$0x1]  ;;  %v48_v63 = vld [vmem:[%s1120_s0 + $0x88] sm:$0x1]  ;;  %v55_v62 = vld [vmem:[%s1120_s0 + $0xa4] sm:$0x1]  ;;  %v1130_v33 = vunpack.c.h.bf16 %v900_v24  ;;  %v1136_v24 = vunpack.c.h.bf16 %v839_v2 }
  0x18   :  { %341 = vmatprep.subr.mxu0 %v244_v42  ;;  %606 = vmatpush3.msra.mxu1 %v245_v43  ;;  %v923_v42 = vld [vmem:[%s1120_s0 + $0xa8] sm:$0xff]   ;;  %v928_v43 = vld [vmem:[%s1120_s0 + $0xb0] sm:$0xff]   ;;  %v62_v44 = vld [vmem:[%s1120_s0 + $0xc0] sm:$0x1]  ;;  %v97_v45 = vunpack.c.l.bf16 %v41_v36  ;;  %v111_v52 = vunpack.c.l.bf16 %v55_v62  ;;  %v132_v62 = vsel %vm131_vm0, %v76_v26, 0.0  ;;  %v1133_v36 = vunpack.c.h.bf16 %v859_v10 }
  0x19   :  { %342 = vmatpush1.msra.mxu0 %v243_v50  ;;  %607 = vmatprep.subr.mxu1 %v620_v1  ;;  %v933_v50 = vld [vmem:[%s1120_s0 + $0xb8] sm:$0xff]   ;;  %v232_v31 = vld [vmem:[%s1119_s1 + $0x8] sm:$0xff]  ;;  %v233_v53 = vld [vmem:[%s1119_s1 + $0x10] sm:$0xff]  ;;  %v1127_v60 = vunpack.c.h.bf16 %v923_v42 }
  0x1a   :  { %343 = vmatprep.subr.mxu0 %v241_v58  ;;  %608 = vmatpush3.msra.mxu1 %v242_v4  ;;  %v951_v4 = vld [vmem:[%s1120_s0 + $0xc8] sm:$0xff]   ;;  %v977_v35 = vld [vmem:[%s1120_s0 + $0xc4] ss:$20 sps:$4 sm:$0xff]   ;;  %v984_v17 = vld [vmem:[%s1120_s0 + $0xdc] sm:$0x1]  ;;  %v90_v58 = vunpack.c.l.bf16 %v888_v20  ;;  %v118_v20 = vunpack.c.l.bf16 %v62_v44  ;;  %v140_v44 = vadd.f32 %v481_v46, %v77_v27  ;;  %v171_v51 = vsel %vm131_vm0, %v97_v45, 0.0 }
  0x1b   :  { %344 = vmatpush1.msra.mxu0 %v240_v3  ;;  %609 = vmatprep.subr.mxu1 %v620_v1  ;;  %v969_v3 = vld [vmem:[%s1120_s0 + $0xd0] sm:$0xff]   ;;  %v119_v40 = vunpack.c.l.bf16 %v977_v35  ;;  %v124_v21 = vunpack.c.h.bf16 %v977_v35  ;;  %v192_v45 = vadd.f32 %v521_v30, %v105_v22  ;;  %v1129_v22 = vunpack.c.l.bf16 %v839_v2 }
  0x1c   :  { %345 = vmatprep.subr.mxu0 %v238_v11  ;;  %610 = vmatpush3.msra.mxu1 %v239_v12  ;;  %v82_v11 = vunpack.c.h.bf16 %v825_v59  ;;  %v83_v12 = vunpack.c.l.bf16 %v871_v13  ;;  %v231_v13 = vld [vmem:[%s1119_s1] sm:$0xff]  ;;  %v1124_v59 = vunpack.c.l.bf16 %v789_v48  ;;  %v210_v26 = vsel %vm131_vm0, %v118_v20, 0.0 }
  0x1d   :  { %346 = vmatpush1.msra.mxu0 %v237_v19  ;;  %611 = vmatprep.subr.mxu1 %v620_v1  ;;  %v104_v19 = vunpack.c.l.bf16 %v48_v63  ;;  %v126_v63 = vadd.f32 %v470_v38, %v469_v37  ;;  %v158_v37 = vsel %vm131_vm0, %v90_v58, 0.0  ;;  %v166_v38 = vadd.f32 %v501_v5, %v91_v7 }
  0x1e   :  { %347 = vmatprep.subr.mxu0 %v235_v28  ;;  %612 = vmatpush3.msra.mxu1 %v236_v29  ;;  %v125_v28 = vunpack.c.l.bf16 %v984_v17  ;;  %v145_v8 = vsel %vm131_vm0, %v83_v12, 0.0  ;;  %v1125_v7 = vunpack.c.l.bf16 %v859_v10  ;;  %v1131_v27 = vunpack.c.l.bf16 %v758_v34 }
  0x1f   :  { %348 = vmatpush1.msra.mxu0 %v234_v23  ;;  %613 = vmatprep.subr.mxu1 %v620_v1  ;;  %v127_v46 = vadd.f32 %v473_v39, %v126_v63  ;;  %v184_v49 = vsel %vm131_vm0, %v104_v19, 0.0  ;;  %v167_v55 = vadd.f32 %v502_v6, %v166_v38  ;;  %v197_v39 = vsel %vm131_vm0, %v111_v52, 0.0 }
  0x20   :  { %349 = vmatprep.subr.mxu0 %v232_v31  ;;  %614 = vmatpush3.msra.mxu1 %v233_v53  ;;  %v141_v53 = vadd.f32 %v482_v47, %v140_v44  ;;  %v1128_v6 = vunpack.c.h.bf16 %v811_v56  ;;  %v193_v23 = vadd.f32 %v1130_v33, %v192_v45  ;;  %v1132_v30 = vunpack.c.h.bf16 %v789_v48 }
  0x21   :  { %350 = vmatpush1.msra.mxu0 %v231_v13  ;;  %615 = vmatprep.mubr.msk.f32.mxu1 %vm621_vm1, %v620_v1  ;;  %v179_v1 = vadd.f32 %v510_v15, %v509_v14  ;;  %v128_v47 = vadd.f32 %v1123_v41, %v127_v46  ;;  %v1126_v14 = vunpack.c.l.bf16 %v923_v42  ;;  %v168_v52 = vadd.f32 %v1129_v22, %v167_v55 }
  0x22   :  { %v142_v5 = vadd.f32 %v1124_v59, %v141_v53  ;;  %v155_v15 = vadd.f32 %v1128_v6, %v154_v54  ;;  %v1134_v56 = vunpack.c.l.bf16 %v928_v43  ;;  %v1135_v12 = vunpack.c.l.bf16 %v816_v57 }
  0x23   :  { %v180_v9 = vadd.f32 %v1125_v7, %v179_v1  ;;  %v205_v0 = vadd.f32 %v1127_v60, %v1126_v14  ;;  %v129_v29 = vadd.f32 %v1131_v27, %v128_v47  ;;  %v169_v19 = vadd.f32 %v1136_v24, %v168_v52 }
  0x24   :  { %v143_v31 = vadd.f32 %v1132_v30, %v142_v5  ;;  %v156_v13 = vadd.f32 %v1135_v12, %v155_v15  ;;  %v1137_v20 = vunpack.c.l.bf16 %v905_v25  ;;  %v1138_v44 = vunpack.c.l.bf16 %v951_v4 }
  0x25   :  { %v181_v42 = vadd.f32 %v1133_v36, %v180_v9  ;;  %v206_v58 = vadd.f32 %v1134_v56, %v205_v0  ;;  %v1139_v48 = vunpack.c.h.bf16 %v758_v34  ;;  %v1140_v46 = vunpack.c.l.bf16 %v880_v18 }
  0x26   :  { %v194_v63 = vadd.f32 %v1137_v20, %v193_v23  ;;  %v218_v32 = vadd.f32 %v1138_v44, %v119_v40  ;;  %v144_v10 = vadd.f32 %v143_v31, %v82_v11  ;;  %v1141_v1 = vunpack.c.h.bf16 %v928_v43 }
  0x27   :  { %v130_v38 = vadd.f32 %v1139_v48, %v129_v29  ;;  %v182_v53 = vadd.f32 %v1140_v46, %v181_v42  ;;  %v1142_v55 = vunpack.c.h.bf16 %v816_v57  ;;  %v170_v45 = vadd.f32 %v169_v19, %v96_v61 }
  0x28   :  { %v207_v54 = vadd.f32 %v1141_v1, %v206_v58  ;;  %v1143_v41 = vunpack.c.h.bf16 %v905_v25  ;;  %v1144_v59 = vunpack.c.h.bf16 %v951_v4  ;;  %v146_v34 = vadd.f32 %v145_v8, %v144_v10 }
  0x29   :  { %v157_v2 = vadd.f32 %v1142_v55, %v156_v13  ;;  %v133_v5 = vadd.f32 %v132_v62, %v130_v38  ;;  %v1145_v11 = vunpack.c.h.bf16 %v880_v18  ;;  %v1146_v9 = vunpack.c.l.bf16 %v933_v50 }
  0x2a   :  { %v195_v47 = vadd.f32 %v1143_v41, %v194_v63  ;;  %v219_v40 = vadd.f32 %v1144_v59, %v218_v32  ;;  %v172_v60 = vadd.f32 %v171_v51, %v170_v45  ;;  %v1147_v57 = vunpack.c.l.bf16 %v969_v3 }
  0x2b   :  { %v183_v7 = vadd.f32 %v1145_v11, %v182_v53  ;;  %v208_v14 = vadd.f32 %v1146_v9, %v207_v54  ;;  %v159_v43 = vadd.f32 %v158_v37, %v157_v2  ;;  %v134_v6 = vrot.slane %v133_v5, 4 }
  0x2c   :  { %v196_v0 = vadd.f32 %v195_v47, %v110_v16  ;;  %v220_v61 = vadd.f32 %v1147_v57, %v219_v40  ;;  %v147_v25 = vrot.slane %v146_v34, 4  ;;  %v1148_v4 = vunpack.c.h.bf16 %v933_v50 }
  0x2d   :  { %v185_v15 = vadd.f32 %v184_v49, %v183_v7  ;;  %v160_v62 = vrot.slane %v159_v43, 4  ;;  %v173_v8 = vrot.slane %v172_v60, 4  ;;  %v1149_v18 = vunpack.c.h.bf16 %v969_v3 }
  0x2e   :  { %v209_v22 = vadd.f32 %v1148_v4, %v208_v14  ;;  %v198_v52 = vadd.f32 %v197_v39, %v196_v0  ;;  %v135_v23 = vadd.f32 %v134_v6, %v133_v5  ;;  %v148_v37 = vadd.f32 %v147_v25, %v146_v34 }
  0x2f   :  { %v221_v33 = vadd.f32 %v1149_v18, %v220_v61  ;;  %v186_v51 = vrot.slane %v185_v15, 4  ;;  %v161_v27 = vadd.f32 %v160_v62, %v159_v43  ;;  %v174_v29 = vadd.f32 %v173_v8, %v172_v60  ;;  %v279_v62 = vld [vmem:[%s1121_s2] sm:$0x7] }
  0x30   :  { %v211_v16 = vadd.f32 %v210_v26, %v209_v22  ;;  %v199_v30 = vrot.slane %v198_v52, 4  ;;  %v136_v50 = vrot.slane %v135_v23, 2  ;;  %v149_v31 = vrot.slane %v148_v37, 2 }
  0x31   :  { %v222_v49 = vadd.f32 %v221_v33, %v124_v21  ;;  %v187_v36 = vadd.f32 %v186_v51, %v185_v15  ;;  %v162_v42 = vrot.slane %v161_v27, 2  ;;  %v175_v3 = vrot.slane %v174_v29, 2 }
  0x32   :  { %v212_v39 = vrot.slane %v211_v16, 4  ;;  %v200_v56 = vadd.f32 %v199_v30, %v198_v52  ;;  %v223_v58 = vsel %vm131_vm0, %v125_v28, 0.0  ;;  %v137_v26 = vadd.f32 %v136_v50, %v135_v23 }
  0x33   :  { %v150_v12 = vadd.f32 %v149_v31, %v148_v37  ;;  %v188_v13 = vrot.slane %v187_v36, 2  ;;  %v163_v19 = vadd.f32 %v162_v42, %v161_v27  ;;  %v176_v20 = vadd.f32 %v175_v3, %v174_v29 }
  0x34   :  { %v213_v24 = vadd.f32 %v212_v39, %v211_v16  ;;  %v201_v35 = vrot.slane %v200_v56, 2  ;;  %v224_v21 = vadd.f32 %v223_v58, %v222_v49  ;;  %v138_v63 = vrot.slane %v137_v26, 1 }
  0x35   :  { %v151_v44 = vrot.slane %v150_v12, 1  ;;  %v189_v32 = vadd.f32 %v188_v13, %v187_v36  ;;  %v164_v38 = vrot.slane %v163_v19, 1  ;;  %v177_v10 = vrot.slane %v176_v20, 1 }
  0x36   :  { %v214_v48 = vrot.slane %v213_v24, 2  ;;  %v202_v46 = vadd.f32 %v201_v35, %v200_v56  ;;  %v225_v53 = vrot.slane %v224_v21, 4  ;;  %v139_v1 = vadd.f32 %v138_v63, %v137_v26 }
  0x37   :  { %v152_v17 = vadd.f32 %v151_v44, %v150_v12  ;;  %v190_v54 = vrot.slane %v189_v32, 1  ;;  %v165_v55 = vadd.f32 %v164_v38, %v163_v19  ;;  %v178_v2 = vadd.f32 %v177_v10, %v176_v20 }
  0x38   :  { %v215_v28 = vadd.f32 %v214_v48, %v213_v24  ;;  %v203_v45 = vrot.slane %v202_v46, 1  ;;  %v226_v41 = vadd.f32 %v225_v53, %v224_v21  ;;  %v281_v25 = vlaneseq }
  0x39   :  { %v191_v47 = vadd.f32 %v190_v54, %v189_v32  ;;  %v305_v40 = vsel %vm304_vm2, %v152_v17, %v139_v1 }
  0x3a   :  { %v216_v59 = vrot.slane %v215_v28, 1  ;;  %v204_v5 = vadd.f32 %v203_v45, %v202_v46  ;;  %v227_v34 = vrot.slane %v226_v41, 2  ;;  %v307_v11 = vsel %vm306_vm3, %v165_v55, %v305_v40 }
  0x3b   :  { %v309_v9 = vsel %vm308_vm4, %v178_v2, %v307_v11  ;;  %v282_v15 = vshrl.u32 %v281_v25, 7 }
  0x3c   :  { %v217_v7 = vadd.f32 %v216_v59, %v215_v28  ;;  %v228_v14 = vadd.f32 %v227_v34, %v226_v41  ;;  %v311_v43 = vsel %vm310_vm5, %v191_v47, %v309_v9 }
  0x3d   :  { %v313_v60 = vsel %vm312_vm6, %v204_v5, %v311_v43  ;;  %v283_v4 = vsub.s32 0, %v282_v15  ;;  %v291_v22 = vsub.s32 2, %v282_v15  ;;  %v287_v8 = vsub.s32 1, %v282_v15 }
  0x3e   :  { %v229_v0 = vrot.slane %v228_v14, 1  ;;  %v315_v57 = vsel %vm314_vm7, %v217_v7, %v313_v60 }
  0x3f   :  { %v284_v52 = vrot.slane %v279_v62, %v283_v4  ;;  %v292_v18 = vrot.slane %v279_v62, %v291_v22  ;;  %v288_v33 = vrot.slane %v279_v62, %v287_v8 }
  0x40   :  { %v230_v61 = vadd.f32 %v229_v0, %v228_v14 }
  0x42   :  { %v317_v6 = vsel %vm316_vm8, %v230_v61, %v315_v57 }
  0x43   :  { %384 = vmatmul.mubr.f32.vlgmr.msra.gmra.mxu0 %v317_v6  ;;  %616 = vmatmul.mubr.f32.vlgmr.msra.gmra.mxu1 %v317_v6 }
 0x103   :  { %v385_v23 = vpop.f32.mrf.mxu0  ;;  %v456_v37 = vpop.f32.mrf.mxu1 }
 0x104   :  { %v386_v51 = vadd.f32 %v385_v23, %v284_v52  ;;  %v457_v16 = vadd.f32 %v456_v37, %v292_v18 }
 0x105   :  { %v387_v27 = vpop.f32.mrf.mxu0  ;;  %v617_v29 = vpop.f32.mrf.mxu1 }
 0x106   :  { %460 = vst [vmem:[%s1122_s3] sm:$0xff] %v386_v51  ;;  %462 = vst [vmem:[%s1122_s3 + $0x10] sm:$0xff] %v457_v16  ;;  %v388_v30 = vadd.f32 %v387_v27, %v288_v33 }
 0x108   :  { %461 = vst [vmem:[%s1122_s3 + $0x8] sm:$0xff] %v388_v30 }

</bundles_post_ra>
